<compile_context>
chip_gen: v5e
topology: v5e:2x2
jax: 0.10.0
libtpu: 0.0.40
codegen_flags: <defaults>
</compile_context>

<pallas_src>
import jax
import jax.numpy as jnp
from jax.experimental import pallas as pl
from jax.experimental.pallas import tpu as pltpu


def _round_up(n, m):
    return ((n + m - 1) // m) * m


def _mlp_kernel(x_ref, w1_ref, b1_ref, w2_ref, b2_ref, w3_ref, b3_ref, o_ref):
    # fc1 + relu: cast x to bf16 in-kernel (hidden under MXU), f32 accumulation.
    x_bf = x_ref[...].astype(jnp.bfloat16)
    h1 = jnp.dot(x_bf, w1_ref[...], preferred_element_type=jnp.float32)
    h1 = jnp.maximum(h1 + b1_ref[...], 0.0)
    # fc2 + relu
    h2 = jnp.dot(h1.astype(jnp.bfloat16), w2_ref[...],
                 preferred_element_type=jnp.float32)
    h2 = jnp.maximum(h2 + b2_ref[...], 0.0)
    # fc3 (out_features == 1): VPU multiply + cross-lane reduce instead of an
    # MXU matmul with N=1.  Result written lane-dense as a (1, bt) row.
    col = jnp.sum(h2 * w3_ref[...], axis=-1, keepdims=True)        # (bt, 1)
    o_ref[...] = (col.T + b3_ref[...]).astype(o_ref.dtype)         # (1, bt)


def prepare_params(params):
    """One-time param prep (hoisted out of the per-call path):
    bf16 weight casts, f32 bias casts, (256,1)->(1,256) reshape of w3."""
    w1, b1, w2, b2, w3, b3 = params
    return (
        w1.astype(jnp.bfloat16),                     # (1000, 512) bf16
        jnp.reshape(b1, (1, -1)).astype(jnp.float32),  # (1, 512)
        w2.astype(jnp.bfloat16),                     # (512, 256) bf16
        jnp.reshape(b2, (1, -1)).astype(jnp.float32),  # (1, 256)
        jnp.reshape(w3, (1, -1)).astype(jnp.float32),  # (1, 256) row
        jnp.reshape(b3, (1, 1)).astype(jnp.float32),   # (1, 1)
    )


def ppgnet_forward(x, prepared_params, *, batch_tile=512):
    """x: (B, 1000) float32. prepared_params: output of prepare_params().
    Returns (B, 1) float32."""
    w1, b1, w2, b2, w3_row, b3 = prepared_params
    B, D_in = x.shape
    H1 = w1.shape[1]
    H2 = w2.shape[1]

    # Clamp the batch tile for tiny batches (sublane-aligned, x stays f32 so
    # the minimum sublane granularity is 8).
    bt = min(batch_tile, _round_up(B, 8))
    # Keep >= 2 grid steps when there is enough work so both TensorCores get a
    # share of the "parallel" batch axis on v7x.
    if B > 256 and bt >= B:
        bt = _round_up((B + 1) // 2, 8)
    B_pad = _round_up(B, bt)
    num_tiles = B_pad // bt

    # Only the batch axis is (possibly) padded; no dtype round-trip on x.
    x_p = x if B_pad == B else jnp.pad(x, ((0, B_pad - B), (0, 0)))

    flops = 2 * B_pad * (D_in * H1 + H1 * H2 + H2)
    bytes_accessed = (
        B_pad * D_in * 4                      # x (f32)
        + D_in * H1 * 2 + H1 * H2 * 2         # bf16 weights
        + (H1 + H2 + H2 + 1) * 4              # biases + w3 row
        + B_pad * 4                           # output
    )

    out = pl.pallas_call(
        _mlp_kernel,
        out_shape=jax.ShapeDtypeStruct((num_tiles, bt), jnp.float32),
        grid_spec=pltpu.PrefetchScalarGridSpec(
            num_scalar_prefetch=0,
            grid=(num_tiles,),
            in_specs=[
                # batch tile of the input (full feature width; f32)
                pl.BlockSpec((bt, D_in), lambda i: (i, 0)),
                # full weight / bias tensors, resident across the batch grid
                pl.BlockSpec((D_in, H1), lambda i: (0, 0)),
                pl.BlockSpec((1, H1), lambda i: (0, 0)),
                pl.BlockSpec((H1, H2), lambda i: (0, 0)),
                pl.BlockSpec((1, H2), lambda i: (0, 0)),
                pl.BlockSpec((1, H2), lambda i: (0, 0)),
                pl.BlockSpec((1, 1), lambda i: (0, 0)),
            ],
            # lane-dense (1, bt) output row per grid step
            out_specs=pl.BlockSpec((1, bt), lambda i: (i, 0)),
        ),
        compiler_params=pltpu.CompilerParams(
            dimension_semantics=("parallel",),
            vmem_limit_bytes=32 * 1024 * 1024,
        ),
        cost_estimate=pl.CostEstimate(
            flops=flops, transcendentals=0, bytes_accessed=bytes_accessed),
    )(x_p, w1, b1, w2, b2, w3_row, b3)

    return jnp.reshape(out, (B_pad, 1))[:B]


def init_params(key):
    """Deterministic parameter init mirroring nn.Linear shapes.
    fc1: 1000->512, fc2: 512->256, fc3: 256->1 (weights stored transposed)."""
    k1, k2, k3, k4, k5, k6 = jax.random.split(key, 6)

    def lin(kw, kb, fan_in, fan_out):
        bound = 1.0 / jnp.sqrt(fan_in)
        w = jax.random.uniform(kw, (fan_in, fan_out), jnp.float32, -bound, bound)
        b = jax.random.uniform(kb, (1, fan_out), jnp.float32, -bound, bound)
        return w, b

    w1, b1 = lin(k1, k2, 1000, 512)
    w2, b2 = lin(k3, k4, 512, 256)
    w3, b3 = lin(k5, k6, 256, 1)
    return (w1, b1, w2, b2, w3, b3)


def _reference(x, params):
    # Full f32 reference (the kernel uses bf16 matmul operands, so compare
    # with a tolerance that covers bf16 rounding).
    w1, b1, w2, b2, w3, b3 = params
    h1 = jnp.maximum(x @ w1 + b1, 0.0)
    h2 = jnp.maximum(h1 @ w2 + b2, 0.0)
    return h2 @ w3 + b3


if __name__ == "__main__":
    key = jax.random.PRNGKey(0)
    kx, kp = jax.random.split(key)
    B = 8
    x = jax.random.normal(kx, (B, 1000), jnp.float32)
    params = init_params(kp)
    prepared = prepare_params(params)   # one-time weight prep (hoisted)

    out = ppgnet_forward(x, prepared)
    out = jax.block_until_ready(out)

    ref = _reference(x, params)
    assert out.shape == (B, 1), f"bad output shape {out.shape}"
    # bf16 matmul operands with f32 accumulation -> loose tolerance vs f32 ref.
    assert jnp.allclose(out, ref, atol=5e-2, rtol=5e-2), "mismatch vs reference"

    print("KERNEL_OK")
</pallas_src>

<mosaic_0001>
module attributes {stable_mosaic.version = 11 : i64} {
  func.func @_mlp_kernel(%arg0: i32, %arg1: memref<8x1000xf32, #tpu.memory_space<vmem>>, %arg2: memref<1000x512xbf16, #tpu.memory_space<vmem>>, %arg3: memref<1x512xf32, #tpu.memory_space<vmem>>, %arg4: memref<512x256xbf16, #tpu.memory_space<vmem>>, %arg5: memref<1x256xf32, #tpu.memory_space<vmem>>, %arg6: memref<1x256xf32, #tpu.memory_space<vmem>>, %arg7: memref<1x1xf32, #tpu.memory_space<vmem>>, %arg8: memref<1x8xf32, #tpu.memory_space<vmem>>) attributes {dimension_semantics = [#tpu.dimension_semantics<parallel>], iteration_bounds = array<i64: 1>, scalar_prefetch = 0 : i64, scratch_operands = 0 : i64, tpu.core_type = #tpu.core_type<tc>, window_params = [{transform_indices = @transform_0, window_bounds = array<i64: 8, 1000>}, {pipeline_mode = #tpu.pipeline_mode<synchronous>, transform_indices = @transform_1, window_bounds = array<i64: 1000, 512>}, {pipeline_mode = #tpu.pipeline_mode<synchronous>, transform_indices = @transform_2, window_bounds = array<i64: 1, 512>}, {pipeline_mode = #tpu.pipeline_mode<synchronous>, transform_indices = @transform_3, window_bounds = array<i64: 512, 256>}, {pipeline_mode = #tpu.pipeline_mode<synchronous>, transform_indices = @transform_4, window_bounds = array<i64: 1, 256>}, {pipeline_mode = #tpu.pipeline_mode<synchronous>, transform_indices = @transform_5, window_bounds = array<i64: 1, 256>}, {pipeline_mode = #tpu.pipeline_mode<synchronous>, transform_indices = @transform_6, window_bounds = array<i64: 1, 1>}, {transform_indices = @transform_7, window_bounds = array<i64: 1, 8>}]} {
    %c0 = arith.constant 0 : index
    %c0_0 = arith.constant 0 : index
    %0 = vector.load %arg1[%c0, %c0_0] : memref<8x1000xf32, #tpu.memory_space<vmem>>, vector<8x1000xf32>
    %1 = arith.truncf %0 : vector<8x1000xf32> to vector<8x1000xbf16>
    %c0_1 = arith.constant 0 : index
    %c0_2 = arith.constant 0 : index
    %2 = vector.load %arg2[%c0_1, %c0_2] : memref<1000x512xbf16, #tpu.memory_space<vmem>>, vector<1000x512xbf16>
    %cst = arith.constant dense<0.000000e+00> : vector<8x512xf32>
    %3 = tpu.matmul %1, %2, %cst {dimension_numbers = #tpu.dot_dimension_numbers<[1], [0], [0], [1], [0, 0, 1, 1], [], []>} : vector<8x1000xbf16>, vector<1000x512xbf16>, vector<8x512xf32> -> vector<8x512xf32>
    %c0_3 = arith.constant 0 : index
    %c0_4 = arith.constant 0 : index
    %4 = vector.load %arg3[%c0_3, %c0_4] : memref<1x512xf32, #tpu.memory_space<vmem>>, vector<1x512xf32>
    %5 = vector.broadcast %4 : vector<1x512xf32> to vector<8x512xf32>
    %6 = arith.addf %3, %5 : vector<8x512xf32>
    %cst_5 = arith.constant 0.000000e+00 : f32
    %7 = vector.broadcast %cst_5 : f32 to vector<8x512xf32>
    %8 = arith.maximumf %6, %7 : vector<8x512xf32>
    %9 = arith.truncf %8 : vector<8x512xf32> to vector<8x512xbf16>
    %c0_6 = arith.constant 0 : index
    %c0_7 = arith.constant 0 : index
    %10 = vector.load %arg4[%c0_6, %c0_7] : memref<512x256xbf16, #tpu.memory_space<vmem>>, vector<512x256xbf16>
    %cst_8 = arith.constant dense<0.000000e+00> : vector<8x256xf32>
    %11 = tpu.matmul %9, %10, %cst_8 {dimension_numbers = #tpu.dot_dimension_numbers<[1], [0], [0], [1], [0, 0, 1, 1], [], []>} : vector<8x512xbf16>, vector<512x256xbf16>, vector<8x256xf32> -> vector<8x256xf32>
    %c0_9 = arith.constant 0 : index
    %c0_10 = arith.constant 0 : index
    %12 = vector.load %arg5[%c0_9, %c0_10] : memref<1x256xf32, #tpu.memory_space<vmem>>, vector<1x256xf32>
    %13 = vector.broadcast %12 : vector<1x256xf32> to vector<8x256xf32>
    %14 = arith.addf %11, %13 : vector<8x256xf32>
    %cst_11 = arith.constant 0.000000e+00 : f32
    %15 = vector.broadcast %cst_11 : f32 to vector<8x256xf32>
    %16 = arith.maximumf %14, %15 : vector<8x256xf32>
    %c0_12 = arith.constant 0 : index
    %c0_13 = arith.constant 0 : index
    %17 = vector.load %arg6[%c0_12, %c0_13] : memref<1x256xf32, #tpu.memory_space<vmem>>, vector<1x256xf32>
    %18 = vector.broadcast %17 : vector<1x256xf32> to vector<8x256xf32>
    %19 = arith.mulf %16, %18 : vector<8x256xf32>
    %cst_14 = arith.constant dense<0.000000e+00> : vector<8xf32>
    %20 = vector.multi_reduction <add>, %19, %cst_14 [1] : vector<8x256xf32> to vector<8xf32>
    %21 = vector.shape_cast %20 : vector<8xf32> to vector<8x1xf32>
    %22 = tpu.transpose %21, [1, 0] : vector<8x1xf32> -> vector<1x8xf32>
    %c0_15 = arith.constant 0 : index
    %c0_16 = arith.constant 0 : index
    %23 = vector.load %arg7[%c0_15, %c0_16] : memref<1x1xf32, #tpu.memory_space<vmem>>, vector<1x1xf32>
    %24 = vector.broadcast %23 : vector<1x1xf32> to vector<1x8xf32>
    %25 = arith.addf %22, %24 : vector<1x8xf32>
    %c0_17 = arith.constant 0 : index
    %c0_18 = arith.constant 0 : index
    %26 = vector.load %arg8[%c0_17, %c0_18] : memref<1x8xf32, #tpu.memory_space<vmem>>, vector<1x8xf32>
    tpu.vector_store %arg8[%c0_17, %c0_18], %25 {strides = array<i32>} : memref<1x8xf32, #tpu.memory_space<vmem>>, vector<1x8xf32>,
    return
  }
  func.func @transform_0(%arg0: i32) -> (i32, i32) {
    %c0_i32 = arith.constant 0 : i32
    %c0_i32_0 = arith.constant 0 : i32
    return %arg0, %c0_i32 : i32, i32
  }
  func.func @transform_1(%arg0: i32) -> (i32, i32) {
    %c0_i32 = arith.constant 0 : i32
    %c0_i32_0 = arith.constant 0 : i32
    %c0_i32_1 = arith.constant 0 : i32
    return %c0_i32, %c0_i32_0 : i32, i32
  }
  func.func @transform_2(%arg0: i32) -> (i32, i32) {
    %c0_i32 = arith.constant 0 : i32
    %c0_i32_0 = arith.constant 0 : i32
    %c0_i32_1 = arith.constant 0 : i32
    return %c0_i32, %c0_i32_0 : i32, i32
  }
  func.func @transform_3(%arg0: i32) -> (i32, i32) {
    %c0_i32 = arith.constant 0 : i32
    %c0_i32_0 = arith.constant 0 : i32
    %c0_i32_1 = arith.constant 0 : i32
    return %c0_i32, %c0_i32_0 : i32, i32
  }
  func.func @transform_4(%arg0: i32) -> (i32, i32) {
    %c0_i32 = arith.constant 0 : i32
    %c0_i32_0 = arith.constant 0 : i32
    %c0_i32_1 = arith.constant 0 : i32
    return %c0_i32, %c0_i32_0 : i32, i32
  }
  func.func @transform_5(%arg0: i32) -> (i32, i32) {
    %c0_i32 = arith.constant 0 : i32
    %c0_i32_0 = arith.constant 0 : i32
    %c0_i32_1 = arith.constant 0 : i32
    return %c0_i32, %c0_i32_0 : i32, i32
  }
  func.func @transform_6(%arg0: i32) -> (i32, i32) {
    %c0_i32 = arith.constant 0 : i32
    %c0_i32_0 = arith.constant 0 : i32
    %c0_i32_1 = arith.constant 0 : i32
    return %c0_i32, %c0_i32_0 : i32, i32
  }
  func.func @transform_7(%arg0: i32) -> (i32, i32) {
    %c0_i32 = arith.constant 0 : i32
    %c0_i32_0 = arith.constant 0 : i32
    return %arg0, %c0_i32 : i32, i32
  }
}

</mosaic_0001>

<bundles_post_ra>
// kernel: tpu_custom_call.1
= control target key start
LH: loop header
LB: loop body
LE: loop exit
PB: predicated region body
PF: predicated region fallthrough
CT: control target
= control target key end

     0   :  { %s4514_s0 = inlined_call_operand.hbm [shape: f32[8,1000], index: 0, kind: input, shape index: {}]   ;;  %s4515_s1 = inlined_call_operand.hbm [shape: bf16[1000,512], index: 1, kind: input, shape index: {}]   ;;  %s4516_s2 = inlined_call_operand.hbm [shape: f32[1,512], index: 2, kind: input, shape index: {}]   ;;  %s4517_s3 = inlined_call_operand.hbm [shape: bf16[512,256], index: 3, kind: input, shape index: {}]   ;;  %s4518_s4 = inlined_call_operand.vmem [shape: f32[1,256], index: 4, kind: input, shape index: {}]   ;;  %s4519_s5 = inlined_call_operand.vmem [shape: f32[1,256], index: 5, kind: input, shape index: {}]   ;;  %s4520_s6 = inlined_call_operand.<no memory space> [shape: f32[1,1], index: 6, kind: input, shape index: {}]   ;;  %s4521_s7 = inlined_call_operand.hbm [shape: f32[1,8], index: 7, kind: output, shape index: {}]  }
   0x1   :  { %v12_v0 = vstv %s4520_s6 }
   0x2   :  { %13 = vst [vmem:[#allocation2] sm:$0x1] %v12_v0 }
   0x3   :  { %14 = vsyncpa [#allocation4], 0 }
   0x4   :  { %15 = vsyncpa [#allocation7], 0 }
   0x5   :  { %16 = vsyncpa [#allocation10], 0  ;;  %s33_s28 = sshll.u32 %s4515_s1, 4  ;;  %s34_s28 = int_to_ptr.hbm [resolvable:$true] %s33_s28 }
   0x6   :  { %17 = vsyncpa [#allocation5], 0  ;;  %s4330_s29 = smov [#allocation6]   ;;  %s23_s10 = sshll.u32 %s4514_s0, 4  ;;  %s24_s10 = int_to_ptr.hbm [resolvable:$true] %s23_s10 }
   0x7   :  { %s35_s30 = sshll.u32 %s4330_s29, 4  ;;  %s4331_s11 = smov 256   ;;  %s36_s30 = int_to_ptr.vmem [resolvable:$true] %s35_s30 }
   0x8   :  { %s4332_s12 = smov 16   ;;  %s4333_s6 = smov [#allocation3]  }
   0x9   :  { %41 = dma.hbm_to_vmem [thread:$0]  %s34_s28, 32000, %s36_s30, [#allocation7], %s4331_s11, %s4331_s11, %s4332_s12  }
   0xa   :  { %s25_s13 = sshll.u32 %s4333_s6, 4  ;;  %s47_s16 = sshll.u32 %s4516_s2, 4  ;;  %s26_s13 = int_to_ptr.vmem [resolvable:$true] %s25_s13  ;;  %s48_s16 = int_to_ptr.hbm [resolvable:$true] %s47_s16 }
   0xb   :  { %28 = dma.hbm_to_vmem [thread:$0]  %s24_s10, 1024, %s26_s13, [#allocation4]  }
   0xc   :  { %s57_s18 = sshll.u32 %s4517_s3, 4  ;;  %s4334_s19 = smov [#allocation8]   ;;  %s58_s18 = int_to_ptr.hbm [resolvable:$true] %s57_s18 }
   0xd   :  { %s49_s20 = sshll.u32 %s4334_s19, 4  ;;  %s4335_s0 = smov [#allocation9]   ;;  %s50_s20 = int_to_ptr.vmem [resolvable:$true] %s49_s20 }
   0xe   :  { %52 = dma.hbm_to_vmem [thread:$0]  %s48_s16, 64, %s50_s20, [#allocation7]  }
   0xf   :  { %s59_s21 = sshll.u32 %s4335_s0, 4  ;;  %s4336_s22 = smov 128   ;;  %s60_s21 = int_to_ptr.vmem [resolvable:$true] %s59_s21 }
  0x10   :  { %s4337_s23 = smov 8  }
  0x11   :  { %65 = dma.hbm_to_vmem [thread:$0]  %s58_s18, 8192, %s60_s21, [#allocation10], %s4336_s22, %s4336_s22, %s4337_s23  }
  0x12   :  { %4322 = dma.done.wait [#allocation4], 1024  }
  0x13   :  { %4323 = vsyncadd [#allocation4], 4294966272 }
  0x14   :  { %4324 = dma.done.wait [#allocation7], 32064  }
  0x15   :  { %4325 = vsyncadd [#allocation7], 4294935232 }
  0x16   :  { %4326 = dma.done.wait [#allocation10], 8192  }
  0x17   :  { %4327 = vsyncadd [#allocation10], 4294959104  ;;  %v2738_v1 = vld [vmem:[#allocation6 + $0xe0] sm:$0xf]  ;;  %v3906_v2 = vld [vmem:[#allocation6 + $0xec] sm:$0xf0] }
  0x18   :  { %v2866_v3 = vld [vmem:[#allocation6 + $0x1e0] sm:$0xf]  ;;  %v2739_v4 = vor.u32 %v3906_v2, %v2738_v1  ;;  %v3938_v5 = vld [vmem:[#allocation6 + $0x1ec] sm:$0xf0]  ;;  %vm1619_vm0 = vcmask 1043456   ;;  %vm1615_vm1 = vcmask 850944  }
  0x19   :  { %v2994_v6 = vld [vmem:[#allocation6 + $0x2e0] sm:$0xf]  ;;  %v3970_v7 = vld [vmem:[#allocation6 + $0x2ec] sm:$0xf0]  ;;  %v2867_v8 = vor.u32 %v3938_v5, %v2866_v3  ;;  %s2612_s28 = sshll.u32 %s4521_s7, 4  ;;  %vm2603_vm2 = vcmask 57344   ;;  %s2613_s28 = int_to_ptr.hbm [resolvable:$true] %s2612_s28 }
  0x1a   :  { %v2995_v9 = vor.u32 %v3970_v7, %v2994_v6  ;;  %v3122_v10 = vld [vmem:[#allocation6 + $0x3e0] sm:$0xf]  ;;  %v4002_v11 = vld [vmem:[#allocation6 + $0x3ec] sm:$0xf0]  ;;  %1632 = vmatpush.bf16.msra.mxu0 %v2739_v4 }
  0x1b   :  { %v2722_v12 = vld [vmem:[#allocation6 + $0xc0] sm:$0xf]  ;;  %v3123_v13 = vor.u32 %v4002_v11, %v3122_v10  ;;  %v3902_v14 = vld [vmem:[#allocation6 + $0xcc] sm:$0xf0]  ;;  %1645 = vmatpush.bf16.msra.mxu1 %v2867_v8 }
  0x1c   :  { %v2850_v15 = vld [vmem:[#allocation6 + $0x1c0] sm:$0xf]  ;;  %v3934_v16 = vld [vmem:[#allocation6 + $0x1cc] sm:$0xf0]  ;;  %1658 = vmatpush.bf16.msra.mxu2 %v2995_v9  ;;  %v2723_v17 = vor.u32 %v3902_v14, %v2722_v12 }
  0x1d   :  { %v2851_v18 = vor.u32 %v3934_v16, %v2850_v15  ;;  %v2978_v19 = vld [vmem:[#allocation6 + $0x2c0] sm:$0xf]  ;;  %v3966_v20 = vld [vmem:[#allocation6 + $0x2cc] sm:$0xf0]  ;;  %1671 = vmatpush.bf16.msra.mxu3 %v3123_v13 }
  0x1e   :  { %v3106_v21 = vld [vmem:[#allocation6 + $0x3c0] sm:$0xf]  ;;  %v2979_v22 = vor.u32 %v3966_v20, %v2978_v19  ;;  %v3998_v23 = vld [vmem:[#allocation6 + $0x3cc] sm:$0xf0]  ;;  %1633 = vmatpush.bf16.msra.mxu0 %v2723_v17 }
  0x1f   :  { %v2706_v24 = vld [vmem:[#allocation6 + $0xa0] sm:$0xf]  ;;  %v3898_v25 = vld [vmem:[#allocation6 + $0xac] sm:$0xf0]  ;;  %v3107_v26 = vor.u32 %v3998_v23, %v3106_v21  ;;  %1646 = vmatpush.bf16.msra.mxu1 %v2851_v18 }
  0x20   :  { %v2834_v27 = vld [vmem:[#allocation6 + $0x1a0] sm:$0xf]  ;;  %v3930_v28 = vld [vmem:[#allocation6 + $0x1ac] sm:$0xf0]  ;;  %v2707_v30 = vor.u32 %v3898_v25, %v2706_v24  ;;  %1659 = vmatpush.bf16.msra.mxu2 %v2979_v22 }
  0x21   :  { %v2962_v29 = vld [vmem:[#allocation6 + $0x2a0] sm:$0xf]  ;;  %v3962_v31 = vld [vmem:[#allocation6 + $0x2ac] sm:$0xf0]  ;;  %v2835_v34 = vor.u32 %v3930_v28, %v2834_v27  ;;  %1672 = vmatpush.bf16.msra.mxu3 %v3107_v26 }
  0x22   :  { %v3090_v32 = vld [vmem:[#allocation6 + $0x3a0] sm:$0xf]  ;;  %v3994_v33 = vld [vmem:[#allocation6 + $0x3ac] sm:$0xf0]  ;;  %v2963_v35 = vor.u32 %v3962_v31, %v2962_v29  ;;  %1634 = vmatpush.bf16.msra.mxu0 %v2707_v30 }
  0x23   :  { %v2690_v36 = vld [vmem:[#allocation6 + $0x80] sm:$0xf]  ;;  %v3894_v37 = vld [vmem:[#allocation6 + $0x8c] sm:$0xf0]  ;;  %v3091_v39 = vor.u32 %v3994_v33, %v3090_v32  ;;  %1647 = vmatpush.bf16.msra.mxu1 %v2835_v34 }
  0x24   :  { %v2818_v38 = vld [vmem:[#allocation6 + $0x180] sm:$0xf]  ;;  %v3926_v40 = vld [vmem:[#allocation6 + $0x18c] sm:$0xf0]  ;;  %v2691_v45 = vor.u32 %v3894_v37, %v2690_v36  ;;  %1660 = vmatpush.bf16.msra.mxu2 %v2963_v35 }
  0x25   :  { %v2946_v41 = vld [vmem:[#allocation6 + $0x280] sm:$0xf]  ;;  %v3958_v42 = vld [vmem:[#allocation6 + $0x28c] sm:$0xf0]  ;;  %v2819_v46 = vor.u32 %v3926_v40, %v2818_v38  ;;  %1673 = vmatpush.bf16.msra.mxu3 %v3091_v39 }
  0x26   :  { %v3074_v43 = vld [vmem:[#allocation6 + $0x380] sm:$0xf]  ;;  %v3990_v44 = vld [vmem:[#allocation6 + $0x38c] sm:$0xf0]  ;;  %v2947_v47 = vor.u32 %v3958_v42, %v2946_v41  ;;  %1635 = vmatpush.bf16.msra.mxu0 %v2691_v45 }
  0x27   :  { %v2674_v48 = vld [vmem:[#allocation6 + $0x60] sm:$0xf]  ;;  %v3890_v49 = vld [vmem:[#allocation6 + $0x6c] sm:$0xf0]  ;;  %v3075_v51 = vor.u32 %v3990_v44, %v3074_v43  ;;  %1648 = vmatpush.bf16.msra.mxu1 %v2819_v46 }
  0x28   :  { %v2802_v50 = vld [vmem:[#allocation6 + $0x160] sm:$0xf]  ;;  %v3922_v52 = vld [vmem:[#allocation6 + $0x16c] sm:$0xf0]  ;;  %v2675_v57 = vor.u32 %v3890_v49, %v2674_v48  ;;  %1661 = vmatpush.bf16.msra.mxu2 %v2947_v47 }
  0x29   :  { %v2930_v53 = vld [vmem:[#allocation6 + $0x260] sm:$0xf]  ;;  %v3954_v54 = vld [vmem:[#allocation6 + $0x26c] sm:$0xf0]  ;;  %v2803_v58 = vor.u32 %v3922_v52, %v2802_v50  ;;  %1674 = vmatpush.bf16.msra.mxu3 %v3075_v51 }
  0x2a   :  { %v3058_v55 = vld [vmem:[#allocation6 + $0x360] sm:$0xf]  ;;  %v3986_v56 = vld [vmem:[#allocation6 + $0x36c] sm:$0xf0]  ;;  %v2931_v59 = vor.u32 %v3954_v54, %v2930_v53  ;;  %1636 = vmatpush.bf16.msra.mxu0 %v2675_v57 }
  0x2b   :  { %v2658_v60 = vld [vmem:[#allocation6 + $0x40] sm:$0xf]  ;;  %v3886_v61 = vld [vmem:[#allocation6 + $0x4c] sm:$0xf0]  ;;  %v3059_v63 = vor.u32 %v3986_v56, %v3058_v55  ;;  %1649 = vmatpush.bf16.msra.mxu1 %v2803_v58 }
  0x2c   :  { %v2786_v62 = vld [vmem:[#allocation6 + $0x140] sm:$0xf]  ;;  %v3918_v0 = vld [vmem:[#allocation6 + $0x14c] sm:$0xf0]  ;;  %v2659_v5 = vor.u32 %v3886_v61, %v2658_v60  ;;  %1662 = vmatpush.bf16.msra.mxu2 %v2931_v59 }
  0x2d   :  { %v2914_v1 = vld [vmem:[#allocation6 + $0x240] sm:$0xf]  ;;  %v3950_v2 = vld [vmem:[#allocation6 + $0x24c] sm:$0xf0]  ;;  %v2787_v6 = vor.u32 %v3918_v0, %v2786_v62  ;;  %1675 = vmatpush.bf16.msra.mxu3 %v3059_v63 }
  0x2e   :  { %v3042_v3 = vld [vmem:[#allocation6 + $0x340] sm:$0xf]  ;;  %v3982_v4 = vld [vmem:[#allocation6 + $0x34c] sm:$0xf0]  ;;  %v2915_v7 = vor.u32 %v3950_v2, %v2914_v1  ;;  %1637 = vmatpush.bf16.msra.mxu0 %v2659_v5 }
  0x2f   :  { %v2642_v8 = vld [vmem:[#allocation6 + $0x20] sm:$0xf]  ;;  %v3882_v9 = vld [vmem:[#allocation6 + $0x2c] sm:$0xf0]  ;;  %v3043_v11 = vor.u32 %v3982_v4, %v3042_v3  ;;  %1650 = vmatpush.bf16.msra.mxu1 %v2787_v6  ;;  %v92_v4 = vld [vmem:[#allocation3 + $0x18] sm:$0xff] }
  0x30   :  { %v2770_v10 = vld [vmem:[#allocation6 + $0x120] sm:$0xf]  ;;  %v3914_v12 = vld [vmem:[#allocation6 + $0x12c] sm:$0xf0]  ;;  %v2643_v17 = vor.u32 %v3882_v9, %v2642_v8  ;;  %1663 = vmatpush.bf16.msra.mxu2 %v2915_v7  ;;  %v4404_v7 = vpack.c.bf16 %v92_v4, %v92_v4 }
  0x31   :  { %v2898_v13 = vld [vmem:[#allocation6 + $0x220] sm:$0xf]  ;;  %v3946_v14 = vld [vmem:[#allocation6 + $0x22c] sm:$0xf0]  ;;  %v2771_v21 = vor.u32 %v3914_v12, %v2770_v10  ;;  %1676 = vmatpush.bf16.msra.mxu3 %v3043_v11 }
  0x32   :  { %v3026_v15 = vld [vmem:[#allocation6 + $0x320] sm:$0xf]  ;;  %v3978_v16 = vld [vmem:[#allocation6 + $0x32c] sm:$0xf0]  ;;  %v2899_v22 = vor.u32 %v3946_v14, %v2898_v13  ;;  %1638 = vmatpush.bf16.msra.mxu0 %v2643_v17  ;;  %v90_v14 = vld [vmem:[#allocation3 + $0x8] sm:$0xff] }
  0x33   :  { %v2626_v18 = vld [vmem:[#allocation6] sm:$0xf]  ;;  %v3878_v19 = vld [vmem:[#allocation6 + $0xc] sm:$0xf0]  ;;  %v3027_v27 = vor.u32 %v3978_v16, %v3026_v15  ;;  %1651 = vmatpush.bf16.msra.mxu1 %v2771_v21 }
  0x34   :  { %v4395_v20 = vld [vmem:[#allocation6 + $0x7c0] sm:$0xff]  ;;  %v3910_v24 = vld [vmem:[#allocation6 + $0x10c] sm:$0xf0]  ;;  %v2627_v34 = vor.u32 %v3878_v19, %v2626_v18  ;;  %1664 = vmatpush.bf16.msra.mxu2 %v2899_v22  ;;  %v4407_v19 = vpack.c.bf16 %v90_v14, %v90_v14 }
  0x35   :  { %v2754_v23 = vld [vmem:[#allocation6 + $0x100] sm:$0xf]  ;;  %v1111_v26 = vunpack.c.l.b16 %v4395_v20  ;;  %v3942_v28 = vld [vmem:[#allocation6 + $0x20c] sm:$0xf0]  ;;  %1677 = vmatpush.bf16.msra.mxu3 %v3027_v27  ;;  %v3968_v14 = vld [vmem:[#allocation6 + $0x2e4] sm:$0xf] }
  0x36   :  { %v2882_v25 = vld [vmem:[#allocation6 + $0x200] sm:$0xf]  ;;  %v3974_v30 = vld [vmem:[#allocation6 + $0x30c] sm:$0xf0]  ;;  %v2755_v38 = vor.u32 %v3910_v24, %v2754_v23  ;;  %1639 = vmatpush.bf16.msra.mxu0 %v2627_v34 }
  0x37   :  { %v3010_v29 = vld [vmem:[#allocation6 + $0x300] sm:$0xf]  ;;  %v4034_v32 = vld [vmem:[#allocation6 + $0x4ec] sm:$0xf0]  ;;  %v2883_v39 = vor.u32 %v3942_v28, %v2882_v25  ;;  %v1363_v40 = vpack.c.b16 %v1111_v26, %v1111_v26 }
  0x38   :  { %v3250_v31 = vld [vmem:[#allocation6 + $0x4e0] sm:$0xf]  ;;  %v4066_v35 = vld [vmem:[#allocation6 + $0x5ec] sm:$0xf0]  ;;  %v3011_v42 = vor.u32 %v3974_v30, %v3010_v29  ;;  %1652 = vmatpush.bf16.msra.mxu1 %v2755_v38 }
  0x39   :  { %v3378_v33 = vld [vmem:[#allocation6 + $0x5e0] sm:$0xf]  ;;  %v4098_v37 = vld [vmem:[#allocation6 + $0x6ec] sm:$0xf0]  ;;  %v3251_v43 = vor.u32 %v4034_v32, %v3250_v31  ;;  %1665 = vmatpush.bf16.msra.mxu2 %v2883_v39  ;;  %v1621_v53 = vsel %vm1619_vm0, %v1363_v40, 0 }
  0x3a   :  { %v3506_v36 = vld [vmem:[#allocation6 + $0x6e0] sm:$0xf]  ;;  %v91_v41 = vld [vmem:[#allocation3 + $0x10] sm:$0xff]  ;;  %v3379_v44 = vor.u32 %v4066_v35, %v3378_v33  ;;  %1678 = vmatpush.bf16.msra.mxu3 %v3011_v42 }
  0x3b   :  { %v3507_v45 = vor.u32 %v4098_v37, %v3506_v36  ;;  %v3234_v46 = vld [vmem:[#allocation6 + $0x4c0] sm:$0xf]  ;;  %v4030_v47 = vld [vmem:[#allocation6 + $0x4cc] sm:$0xf0]  ;;  %v4398_v52 = vpack.c.bf16 %v91_v41, %v91_v41  ;;  %1684 = vmatpush.bf16.msrb.mxu0 %v3251_v43  ;;  %1653 = vmatmul.bf16.vlgmr.msra.gmra.mxu1 %v4407_v19 }
  0x3c   :  { %v3362_v48 = vld [vmem:[#allocation6 + $0x5c0] sm:$0xf]  ;;  %v4062_v49 = vld [vmem:[#allocation6 + $0x5cc] sm:$0xf0]  ;;  %v3235_v56 = vor.u32 %v4030_v47, %v3234_v46  ;;  %1697 = vmatpush.bf16.msrb.mxu1 %v3379_v44 }
  0x3d   :  { %v3490_v50 = vld [vmem:[#allocation6 + $0x6c0] sm:$0xf]  ;;  %v4094_v51 = vld [vmem:[#allocation6 + $0x6cc] sm:$0xf0]  ;;  %1710 = vmatpush.bf16.msrb.mxu2 %v3507_v45  ;;  %v3363_v59 = vor.u32 %v4062_v49, %v3362_v48  ;;  %1679 = vmatmul.bf16.vlgmr.msra.gmra.mxu3 %v4404_v7 }
  0x3e   :  { %v3602_v54 = vld [vmem:[#allocation6 + $0x7a0] sm:$0xf]  ;;  %v4122_v55 = vld [vmem:[#allocation6 + $0x7ac] sm:$0xf0]  ;;  %v3491_v60 = vor.u32 %v4094_v51, %v3490_v50  ;;  %1724 = vmatpush.bf16.msrb.mxu3 %v1621_v53  ;;  %1666 = vmatmul.bf16.vlgmr.msra.gmra.mxu2 %v4398_v52 }
  0x3f   :  { %v3218_v57 = vld [vmem:[#allocation6 + $0x4a0] sm:$0xf]  ;;  %v4026_v58 = vld [vmem:[#allocation6 + $0x4ac] sm:$0xf0]  ;;  %v3603_v0 = vor.u32 %v4122_v55, %v3602_v54  ;;  %1685 = vmatpush.bf16.msrb.mxu0 %v3235_v56 }
  0x40   :  { %v3346_v61 = vld [vmem:[#allocation6 + $0x5a0] sm:$0xf]  ;;  %v4058_v62 = vld [vmem:[#allocation6 + $0x5ac] sm:$0xf0]  ;;  %v3219_v8 = vor.u32 %v4026_v58, %v3218_v57  ;;  %1698 = vmatpush.bf16.msrb.mxu1 %v3363_v59 }
  0x41   :  { %v89_v63 = vld [vmem:[#allocation3] sm:$0xff]  ;;  %v4090_v2 = vld [vmem:[#allocation6 + $0x6ac] sm:$0xf0]  ;;  %1711 = vmatpush.bf16.msrb.mxu2 %v3491_v60  ;;  %v3347_v10 = vor.u32 %v4058_v62, %v3346_v61  ;;  %v2740_v62 = vld [vmem:[#allocation6 + $0xf0] sm:$0xf0] }
  0x42   :  { %v3474_v1 = vld [vmem:[#allocation6 + $0x6a0] sm:$0xf]  ;;  %v4402_v3 = vpack.c.bf16 %v89_v63, %v89_v63  ;;  %v4118_v6 = vld [vmem:[#allocation6 + $0x78c] sm:$0xf0]  ;;  %1725 = vmatpush.bf16.msrb.mxu3 %v3603_v0  ;;  %v3904_v60 = vld [vmem:[#allocation6 + $0xe4] sm:$0xf] }
  0x43   :  { %v3586_v5 = vld [vmem:[#allocation6 + $0x780] sm:$0xf]  ;;  %v3475_v11 = vor.u32 %v4090_v2, %v3474_v1  ;;  %v4022_v12 = vld [vmem:[#allocation6 + $0x48c] sm:$0xf0]  ;;  %1686 = vmatpush.bf16.msrb.mxu0 %v3219_v8 }
  0x44   :  { %v3202_v9 = vld [vmem:[#allocation6 + $0x480] sm:$0xf]  ;;  %v3587_v15 = vor.u32 %v4118_v6, %v3586_v5  ;;  %v4054_v16 = vld [vmem:[#allocation6 + $0x58c] sm:$0xf0]  ;;  %1640 = vmatmul.bf16.vlgmr.msra.gmra.mxu0 %v4402_v3  ;;  %1699 = vmatpush.bf16.msrb.mxu1 %v3347_v10  ;;  %v3900_v10 = vld [vmem:[#allocation6 + $0xc4] sm:$0xf] }
  0x45   :  { %v3330_v13 = vld [vmem:[#allocation6 + $0x580] sm:$0xf]  ;;  %v4086_v18 = vld [vmem:[#allocation6 + $0x68c] sm:$0xf0]  ;;  %v3203_v23 = vor.u32 %v4022_v12, %v3202_v9  ;;  %1712 = vmatpush.bf16.msrb.mxu2 %v3475_v11  ;;  %v3936_v11 = vld [vmem:[#allocation6 + $0x1e4] sm:$0xf]  ;;  %v2743_v12 = vor.u32 %v3904_v60, %v2740_v62 }
  0x46   :  { %v3458_v17 = vld [vmem:[#allocation6 + $0x680] sm:$0xf]  ;;  %v4114_v22 = vld [vmem:[#allocation6 + $0x76c] sm:$0xf0]  ;;  %v3331_v24 = vor.u32 %v4054_v16, %v3330_v13  ;;  %1726 = vmatpush.bf16.msrb.mxu3 %v3587_v15  ;;  %v2868_v13 = vld [vmem:[#allocation6 + $0x1f0] sm:$0xf0] }
  0x47   :  { %v3570_v21 = vld [vmem:[#allocation6 + $0x760] sm:$0xf]  ;;  %v3459_v25 = vor.u32 %v4086_v18, %v3458_v17  ;;  %v4018_v27 = vld [vmem:[#allocation6 + $0x46c] sm:$0xf0]  ;;  %1687 = vmatpush.bf16.msrb.mxu0 %v3203_v23  ;;  %v2996_v15 = vld [vmem:[#allocation6 + $0x2f0] sm:$0xf0] }
  0x48   :  { %v3186_v26 = vld [vmem:[#allocation6 + $0x460] sm:$0xf]  ;;  %v3571_v29 = vor.u32 %v4114_v22, %v3570_v21  ;;  %v4050_v30 = vld [vmem:[#allocation6 + $0x56c] sm:$0xf0]  ;;  %1700 = vmatpush.bf16.msrb.mxu1 %v3331_v24  ;;  %v2724_v17 = vld [vmem:[#allocation6 + $0xd0] sm:$0xf0] }
  0x49   :  { %v3314_v28 = vld [vmem:[#allocation6 + $0x560] sm:$0xf]  ;;  %v4082_v32 = vld [vmem:[#allocation6 + $0x66c] sm:$0xf0]  ;;  %v3187_v35 = vor.u32 %v4018_v27, %v3186_v26  ;;  %1713 = vmatpush.bf16.msrb.mxu2 %v3459_v25  ;;  %v4000_v18 = vld [vmem:[#allocation6 + $0x3e4] sm:$0xf]  ;;  %v2871_v26 = vor.u32 %v3936_v11, %v2868_v13  ;;  %v2999_v27 = vor.u32 %v3968_v14, %v2996_v15 }
  0x4a   :  { %v3442_v31 = vld [vmem:[#allocation6 + $0x660] sm:$0xf]  ;;  %v4110_v34 = vld [vmem:[#allocation6 + $0x74c] sm:$0xf0]  ;;  %v3315_v36 = vor.u32 %v4050_v30, %v3314_v28  ;;  %1727 = vmatpush.bf16.msrb.mxu3 %v3571_v29  ;;  %v3124_v21 = vld [vmem:[#allocation6 + $0x3f0] sm:$0xf0] }
  0x4b   :  { %v3554_v33 = vld [vmem:[#allocation6 + $0x740] sm:$0xf]  ;;  %v3443_v37 = vor.u32 %v4082_v32, %v3442_v31  ;;  %v4014_v39 = vld [vmem:[#allocation6 + $0x44c] sm:$0xf0]  ;;  %1688 = vmatpush.bf16.msrb.mxu0 %v3187_v35  ;;  %v3896_v28 = vld [vmem:[#allocation6 + $0xa4] sm:$0xf]  ;;  %v2727_v32 = vor.u32 %v3900_v10, %v2724_v17 }
  0x4c   :  { %v3170_v38 = vld [vmem:[#allocation6 + $0x440] sm:$0xf]  ;;  %v3555_v41 = vor.u32 %v4110_v34, %v3554_v33  ;;  %v4046_v42 = vld [vmem:[#allocation6 + $0x54c] sm:$0xf0]  ;;  %1701 = vmatpush.bf16.msrb.mxu1 %v3315_v36  ;;  %v3932_v29 = vld [vmem:[#allocation6 + $0x1c4] sm:$0xf]  ;;  %v3127_v33 = vor.u32 %v4000_v18, %v3124_v21 }
  0x4d   :  { %v3298_v40 = vld [vmem:[#allocation6 + $0x540] sm:$0xf]  ;;  %v4078_v44 = vld [vmem:[#allocation6 + $0x64c] sm:$0xf0]  ;;  %v3171_v47 = vor.u32 %v4014_v39, %v3170_v38  ;;  %1714 = vmatpush.bf16.msrb.mxu2 %v3443_v37  ;;  %v96_v30 = vld [vmem:[#allocation3 + $0x38] sm:$0xff] }
  0x4e   :  { %v3426_v43 = vld [vmem:[#allocation6 + $0x640] sm:$0xf]  ;;  %v4106_v46 = vld [vmem:[#allocation6 + $0x72c] sm:$0xf0]  ;;  %v3299_v48 = vor.u32 %v4046_v42, %v3298_v40  ;;  %1728 = vmatpush.bf16.msrb.mxu3 %v3555_v41  ;;  %v94_v31 = vld [vmem:[#allocation3 + $0x28] sm:$0xff]  ;;  %v4415_v42 = vpack.c.bf16 %v96_v30, %v96_v30 }
  0x4f   :  { %v3538_v45 = vld [vmem:[#allocation6 + $0x720] sm:$0xf]  ;;  %v3427_v49 = vor.u32 %v4078_v44, %v3426_v43  ;;  %v4010_v51 = vld [vmem:[#allocation6 + $0x42c] sm:$0xf0]  ;;  %1689 = vmatpush.bf16.msrb.mxu0 %v3171_v47  ;;  %v2852_v34 = vld [vmem:[#allocation6 + $0x1d0] sm:$0xf0]  ;;  %v4417_v43 = vpack.c.bf16 %v94_v31, %v94_v31 }
  0x50   :  { %v3154_v50 = vld [vmem:[#allocation6 + $0x420] sm:$0xf]  ;;  %v3539_v54 = vor.u32 %v4106_v46, %v3538_v45  ;;  %v4042_v55 = vld [vmem:[#allocation6 + $0x52c] sm:$0xf0]  ;;  %1702 = vmatpush.bf16.msrb.mxu1 %v3299_v48  ;;  %v3964_v35 = vld [vmem:[#allocation6 + $0x2c4] sm:$0xf]  ;;  %v2855_v44 = vor.u32 %v3932_v29, %v2852_v34 }
  0x51   :  { %v3282_v53 = vld [vmem:[#allocation6 + $0x520] sm:$0xf]  ;;  %v4074_v57 = vld [vmem:[#allocation6 + $0x62c] sm:$0xf0]  ;;  %v3155_v61 = vor.u32 %v4010_v51, %v3154_v50  ;;  %1715 = vmatpush.bf16.msrb.mxu2 %v3427_v49  ;;  %v2980_v36 = vld [vmem:[#allocation6 + $0x2d0] sm:$0xf0] }
  0x52   :  { %v3410_v56 = vld [vmem:[#allocation6 + $0x620] sm:$0xf]  ;;  %v4102_v59 = vld [vmem:[#allocation6 + $0x70c] sm:$0xf0]  ;;  %v3283_v1 = vor.u32 %v4042_v55, %v3282_v53  ;;  %1729 = vmatpush.bf16.msrb.mxu3 %v3539_v54  ;;  %v2708_v38 = vld [vmem:[#allocation6 + $0xb0] sm:$0xf0]  ;;  %v2983_v45 = vor.u32 %v3964_v35, %v2980_v36 }
  0x53   :  { %v3522_v58 = vld [vmem:[#allocation6 + $0x700] sm:$0xf]  ;;  %v4006_v0 = vld [vmem:[#allocation6 + $0x40c] sm:$0xf0]  ;;  %v3411_v2 = vor.u32 %v4074_v57, %v3410_v56  ;;  %1690 = vmatpush.bf16.msrb.mxu0 %v3155_v61  ;;  %v3996_v39 = vld [vmem:[#allocation6 + $0x3c4] sm:$0xf]  ;;  %v2711_v48 = vor.u32 %v3896_v28, %v2708_v38 }
  0x54   :  { %v3138_v63 = vld [vmem:[#allocation6 + $0x400] sm:$0xf]  ;;  %v4038_v5 = vld [vmem:[#allocation6 + $0x50c] sm:$0xf0]  ;;  %v3523_v8 = vor.u32 %v4102_v59, %v3522_v58  ;;  %1703 = vmatpush.bf16.msrb.mxu1 %v3283_v1  ;;  %v3108_v40 = vld [vmem:[#allocation6 + $0x3d0] sm:$0xf0] }
  0x55   :  { %v3266_v4 = vld [vmem:[#allocation6 + $0x500] sm:$0xf]  ;;  %v4070_v9 = vld [vmem:[#allocation6 + $0x60c] sm:$0xf0]  ;;  %v3139_v16 = vor.u32 %v4006_v0, %v3138_v63  ;;  %1716 = vmatpush.bf16.msrb.mxu2 %v3411_v2  ;;  %v3892_v46 = vld [vmem:[#allocation6 + $0x84] sm:$0xf]  ;;  %v3111_v49 = vor.u32 %v3996_v39, %v3108_v40 }
  0x56   :  { %v3394_v6 = vld [vmem:[#allocation6 + $0x600] sm:$0xf]  ;;  %v3267_v22 = vor.u32 %v4038_v5, %v3266_v4  ;;  %v95_v24 = vld [vmem:[#allocation3 + $0x30] sm:$0xff]  ;;  %1730 = vmatpush.bf16.msrb.mxu3 %v3523_v8  ;;  %v3928_v47 = vld [vmem:[#allocation6 + $0x1a4] sm:$0xf] }
  0x57   :  { %v3395_v23 = vor.u32 %v4070_v9, %v3394_v6  ;;  %v93_v25 = vld [vmem:[#allocation3 + $0x20] sm:$0xff]  ;;  %1691 = vmatpush.bf16.msrb.mxu0 %v3139_v16  ;;  %v4411_v37 = vpack.c.bf16 %v95_v24, %v95_v24  ;;  %v2836_v50 = vld [vmem:[#allocation6 + $0x1b0] sm:$0xf0] }
  0x58   :  { %v4413_v41 = vpack.c.bf16 %v93_v25, %v93_v25  ;;  %1704 = vmatpush.bf16.msrb.mxu1 %v3267_v22  ;;  %v3960_v51 = vld [vmem:[#allocation6 + $0x2a4] sm:$0xf]  ;;  %v2964_v53 = vld [vmem:[#allocation6 + $0x2b0] sm:$0xf0]  ;;  %v2839_v57 = vor.u32 %v3928_v47, %v2836_v50 }
  0x59   :  { %1717 = vmatpush.bf16.msrb.mxu2 %v3395_v23  ;;  %v2692_v54 = vld [vmem:[#allocation6 + $0x90] sm:$0xf0]  ;;  %v3992_v55 = vld [vmem:[#allocation6 + $0x3a4] sm:$0xf]  ;;  %3616 = vmatmul.msk.bf16.vlgmr.msrb.gmra.mxu3 %vm1615_vm1, %v4415_v42  ;;  %v2967_v58 = vor.u32 %v3960_v51, %v2964_v53  ;;  %v1112_v51 = vunpack.c.h.b16 %v4395_v20 }
  0x5a   :  { %1736 = vmatpush.bf16.msra.mxu3 %v2743_v12  ;;  %1692 = vmatmul.bf16.vlgmr.msrb.gmra.mxu0 %v4413_v41  ;;  %v3092_v56 = vld [vmem:[#allocation6 + $0x3b0] sm:$0xf0]  ;;  %v3888_v59 = vld [vmem:[#allocation6 + $0x64] sm:$0xf]  ;;  %v2695_v61 = vor.u32 %v3892_v46, %v2692_v54 }
  0x5b   :  { %1749 = vmatpush.bf16.msra.mxu0 %v2871_v26  ;;  %1705 = vmatmul.bf16.vlgmr.msrb.gmra.mxu1 %v4417_v43  ;;  %v3924_v60 = vld [vmem:[#allocation6 + $0x184] sm:$0xf]  ;;  %v3095_v62 = vor.u32 %v3992_v55, %v3092_v56  ;;  %v2820_v63 = vld [vmem:[#allocation6 + $0x190] sm:$0xf0] }
  0x5c   :  { %1762 = vmatpush.bf16.msra.mxu1 %v2999_v27  ;;  %1718 = vmatmul.bf16.vlgmr.msrb.gmra.mxu2 %v4411_v37  ;;  %v3956_v0 = vld [vmem:[#allocation6 + $0x284] sm:$0xf]  ;;  %v2948_v1 = vld [vmem:[#allocation6 + $0x290] sm:$0xf0]  ;;  %v2823_v6 = vor.u32 %v3924_v60, %v2820_v63 }
  0x5d   :  { %1775 = vmatpush.bf16.msra.mxu2 %v3127_v33  ;;  %v2676_v2 = vld [vmem:[#allocation6 + $0x70] sm:$0xf0]  ;;  %v3988_v4 = vld [vmem:[#allocation6 + $0x384] sm:$0xf]  ;;  %v2951_v8 = vor.u32 %v3956_v0, %v2948_v1 }
  0x5e   :  { %1737 = vmatpush.bf16.msra.mxu3 %v2727_v32  ;;  %v3076_v5 = vld [vmem:[#allocation6 + $0x390] sm:$0xf0]  ;;  %v3884_v9 = vld [vmem:[#allocation6 + $0x44] sm:$0xf]  ;;  %v2679_v11 = vor.u32 %v3888_v59, %v2676_v2 }
  0x5f   :  { %1750 = vmatpush.bf16.msra.mxu0 %v2855_v44  ;;  %v3920_v10 = vld [vmem:[#allocation6 + $0x164] sm:$0xf]  ;;  %v3079_v12 = vor.u32 %v3988_v4, %v3076_v5  ;;  %v2804_v13 = vld [vmem:[#allocation6 + $0x170] sm:$0xf0] }
  0x60   :  { %1763 = vmatpush.bf16.msra.mxu1 %v2983_v45  ;;  %v3952_v14 = vld [vmem:[#allocation6 + $0x264] sm:$0xf]  ;;  %v2932_v15 = vld [vmem:[#allocation6 + $0x270] sm:$0xf0]  ;;  %v2807_v21 = vor.u32 %v3920_v10, %v2804_v13 }
  0x61   :  { %1776 = vmatpush.bf16.msra.mxu2 %v3111_v49  ;;  %v2660_v16 = vld [vmem:[#allocation6 + $0x50] sm:$0xf0]  ;;  %v3984_v17 = vld [vmem:[#allocation6 + $0x364] sm:$0xf]  ;;  %v2935_v22 = vor.u32 %v3952_v14, %v2932_v15 }
  0x62   :  { %1738 = vmatpush.bf16.msra.mxu3 %v2711_v48  ;;  %v3060_v18 = vld [vmem:[#allocation6 + $0x370] sm:$0xf0]  ;;  %v3880_v23 = vld [vmem:[#allocation6 + $0x24] sm:$0xf]  ;;  %v2663_v25 = vor.u32 %v3884_v9, %v2660_v16  ;;  %v1364_v9 = vpack.c.b16 %v1112_v51, %v1112_v51 }
  0x63   :  { %1751 = vmatpush.bf16.msra.mxu0 %v2839_v57  ;;  %v3916_v24 = vld [vmem:[#allocation6 + $0x144] sm:$0xf]  ;;  %v3063_v26 = vor.u32 %v3984_v17, %v3060_v18  ;;  %v2788_v27 = vld [vmem:[#allocation6 + $0x150] sm:$0xf0] }
  0x64   :  { %1764 = vmatpush.bf16.msra.mxu1 %v2967_v58  ;;  %v3948_v28 = vld [vmem:[#allocation6 + $0x244] sm:$0xf]  ;;  %v2916_v29 = vld [vmem:[#allocation6 + $0x250] sm:$0xf0]  ;;  %v2791_v33 = vor.u32 %v3916_v24, %v2788_v27 }
  0x65   :  { %1777 = vmatpush.bf16.msra.mxu2 %v3095_v62  ;;  %v2644_v30 = vld [vmem:[#allocation6 + $0x30] sm:$0xf0]  ;;  %v3980_v31 = vld [vmem:[#allocation6 + $0x344] sm:$0xf]  ;;  %v2919_v34 = vor.u32 %v3948_v28, %v2916_v29 }
  0x66   :  { %1739 = vmatpush.bf16.msra.mxu3 %v2695_v61  ;;  %v3044_v32 = vld [vmem:[#allocation6 + $0x350] sm:$0xf0]  ;;  %v3876_v35 = vld [vmem:[#allocation6 + $0x4] sm:$0xf]  ;;  %v2647_v38 = vor.u32 %v3880_v23, %v2644_v30 }
  0x67   :  { %1752 = vmatpush.bf16.msra.mxu0 %v2823_v6  ;;  %v3912_v36 = vld [vmem:[#allocation6 + $0x124] sm:$0xf]  ;;  %v3047_v39 = vor.u32 %v3980_v31, %v3044_v32  ;;  %v2772_v40 = vld [vmem:[#allocation6 + $0x130] sm:$0xf0] }
  0x68   :  { %1765 = vmatpush.bf16.msra.mxu1 %v2951_v8  ;;  %v3944_v44 = vld [vmem:[#allocation6 + $0x224] sm:$0xf]  ;;  %v2900_v45 = vld [vmem:[#allocation6 + $0x230] sm:$0xf0]  ;;  %v2775_v53 = vor.u32 %v3912_v36, %v2772_v40 }
  0x69   :  { %1778 = vmatpush.bf16.msra.mxu2 %v3079_v12  ;;  %v2628_v46 = vld [vmem:[#allocation6 + $0x10] sm:$0xf0]  ;;  %v3976_v47 = vld [vmem:[#allocation6 + $0x324] sm:$0xf]  ;;  %v2903_v54 = vor.u32 %v3944_v44, %v2900_v45 }
  0x6a   :  { %1740 = vmatpush.bf16.msra.mxu3 %v2679_v11  ;;  %v3028_v48 = vld [vmem:[#allocation6 + $0x330] sm:$0xf0]  ;;  %v4032_v49 = vld [vmem:[#allocation6 + $0x4e4] sm:$0xf]  ;;  %v2631_v58 = vor.u32 %v3876_v35, %v2628_v46 }
  0x6b   :  { %1753 = vmatpush.bf16.msra.mxu0 %v2807_v21  ;;  %v3252_v50 = vld [vmem:[#allocation6 + $0x4f0] sm:$0xf0]  ;;  %v3908_v55 = vld [vmem:[#allocation6 + $0x104] sm:$0xf]  ;;  %v3031_v59 = vor.u32 %v3976_v47, %v3028_v48 }
  0x6c   :  { %1766 = vmatpush.bf16.msra.mxu1 %v2935_v22  ;;  %v2756_v56 = vld [vmem:[#allocation6 + $0x110] sm:$0xf0]  ;;  %v3940_v57 = vld [vmem:[#allocation6 + $0x204] sm:$0xf]  ;;  %v3255_v63 = vor.u32 %v4032_v49, %v3252_v50  ;;  %v1624_v22 = vsel %vm1619_vm0, %v1364_v9, 0 }
  0x6d   :  { %1779 = vmatpush.bf16.msra.mxu2 %v3063_v26  ;;  %v2884_v60 = vld [vmem:[#allocation6 + $0x210] sm:$0xf0]  ;;  %v3972_v61 = vld [vmem:[#allocation6 + $0x304] sm:$0xf]  ;;  %v2759_v6 = vor.u32 %v3908_v55, %v2756_v56 }
  0x6e   :  { %1741 = vmatpush.bf16.msra.mxu3 %v2663_v25  ;;  %v3012_v62 = vld [vmem:[#allocation6 + $0x310] sm:$0xf0]  ;;  %v4028_v0 = vld [vmem:[#allocation6 + $0x4c4] sm:$0xf]  ;;  %v2887_v8 = vor.u32 %v3940_v57, %v2884_v60 }
  0x6f   :  { %1754 = vmatpush.bf16.msra.mxu0 %v2791_v33  ;;  %v4064_v1 = vld [vmem:[#allocation6 + $0x5e4] sm:$0xf]  ;;  %v3380_v2 = vld [vmem:[#allocation6 + $0x5f0] sm:$0xf0]  ;;  %v3015_v10 = vor.u32 %v3972_v61, %v3012_v62 }
  0x70   :  { %1767 = vmatpush.bf16.msra.mxu1 %v2919_v34  ;;  %v3236_v4 = vld [vmem:[#allocation6 + $0x4d0] sm:$0xf0]  ;;  %v4096_v20 = vld [vmem:[#allocation6 + $0x6e4] sm:$0xf]  ;;  %v3383_v11 = vor.u32 %v4064_v1, %v3380_v2 }
  0x71   :  { %1780 = vmatpush.bf16.msra.mxu2 %v3047_v39  ;;  %v3508_v5 = vld [vmem:[#allocation6 + $0x6f0] sm:$0xf0]  ;;  %v3239_v12 = vor.u32 %v4028_v0, %v3236_v4  ;;  %v4024_v14 = vld [vmem:[#allocation6 + $0x4a4] sm:$0xf] }
  0x72   :  { %1742 = vmatpush.bf16.msra.mxu3 %v2647_v38  ;;  %v3511_v13 = vor.u32 %v4096_v20, %v3508_v5  ;;  %v4060_v15 = vld [vmem:[#allocation6 + $0x5c4] sm:$0xf]  ;;  %v3364_v16 = vld [vmem:[#allocation6 + $0x5d0] sm:$0xf0] }
  0x73   :  { %1755 = vmatpush.bf16.msra.mxu0 %v2775_v53  ;;  %v3220_v17 = vld [vmem:[#allocation6 + $0x4b0] sm:$0xf0]  ;;  %v4092_v18 = vld [vmem:[#allocation6 + $0x6c4] sm:$0xf]  ;;  %v3367_v25 = vor.u32 %v4060_v15, %v3364_v16 }
  0x74   :  { %1768 = vmatpush.bf16.msra.mxu1 %v2903_v54  ;;  %v3492_v21 = vld [vmem:[#allocation6 + $0x6d0] sm:$0xf0]  ;;  %v4120_v23 = vld [vmem:[#allocation6 + $0x7a4] sm:$0xf]  ;;  %v3223_v26 = vor.u32 %v4024_v14, %v3220_v17 }
  0x75   :  { %1781 = vmatpush.bf16.msra.mxu2 %v3031_v59  ;;  %v3604_v24 = vld [vmem:[#allocation6 + $0x7b0] sm:$0xf0]  ;;  %v3495_v27 = vor.u32 %v4092_v18, %v3492_v21  ;;  %v4020_v28 = vld [vmem:[#allocation6 + $0x484] sm:$0xf] }
  0x76   :  { %1743 = vmatpush.bf16.msra.mxu3 %v2631_v58  ;;  %v4056_v29 = vld [vmem:[#allocation6 + $0x5a4] sm:$0xf]  ;;  %v3348_v30 = vld [vmem:[#allocation6 + $0x5b0] sm:$0xf0]  ;;  %v3607_v31 = vor.u32 %v4120_v23, %v3604_v24 }
  0x77   :  { %1756 = vmatpush.bf16.msra.mxu0 %v2759_v6  ;;  %v3204_v32 = vld [vmem:[#allocation6 + $0x490] sm:$0xf0]  ;;  %v4088_v33 = vld [vmem:[#allocation6 + $0x6a4] sm:$0xf]  ;;  %v3351_v38 = vor.u32 %v4056_v29, %v3348_v30  ;;  %v2874_v29 = vld [vmem:[#allocation6 + $0x1e8] sm:$0xf] }
  0x78   :  { %1769 = vmatpush.bf16.msra.mxu1 %v2887_v8  ;;  %v3476_v34 = vld [vmem:[#allocation6 + $0x6b0] sm:$0xf0]  ;;  %v4116_v35 = vld [vmem:[#allocation6 + $0x784] sm:$0xf]  ;;  %v3207_v39 = vor.u32 %v4020_v28, %v3204_v32  ;;  %v3939_v30 = vld [vmem:[#allocation6 + $0x1f4] sm:$0xf0] }
  0x79   :  { %1782 = vmatpush.bf16.msra.mxu2 %v3015_v10  ;;  %1744 = vmatmul.bf16.vlgmr.msra.gmra.mxu3 %v4402_v3  ;;  %v3588_v36 = vld [vmem:[#allocation6 + $0x790] sm:$0xf0]  ;;  %v3479_v40 = vor.u32 %v4088_v33, %v3476_v34  ;;  %v4016_v44 = vld [vmem:[#allocation6 + $0x464] sm:$0xf]  ;;  %v2746_v32 = vld [vmem:[#allocation6 + $0xe8] sm:$0xf] }
  0x7a   :  { %1788 = vmatpush.bf16.msrb.mxu3 %v3255_v63  ;;  %1757 = vmatmul.bf16.vlgmr.msra.gmra.mxu0 %v4407_v19  ;;  %v4052_v45 = vld [vmem:[#allocation6 + $0x584] sm:$0xf]  ;;  %v3332_v46 = vld [vmem:[#allocation6 + $0x590] sm:$0xf0]  ;;  %v3591_v47 = vor.u32 %v4116_v35, %v3588_v36  ;;  %v3907_v33 = vld [vmem:[#allocation6 + $0xf4] sm:$0xf0] }
  0x7b   :  { %1801 = vmatpush.bf16.msrb.mxu0 %v3383_v11  ;;  %1770 = vmatmul.bf16.vlgmr.msra.gmra.mxu1 %v4398_v52  ;;  %v3188_v48 = vld [vmem:[#allocation6 + $0x470] sm:$0xf0]  ;;  %v4084_v49 = vld [vmem:[#allocation6 + $0x684] sm:$0xf]  ;;  %v3335_v54 = vor.u32 %v4052_v45, %v3332_v46  ;;  %v2875_v45 = vor.u32 %v3939_v30, %v2874_v29  ;;  %v2858_v46 = vld [vmem:[#allocation6 + $0x1c8] sm:$0xf] }
  0x7c   :  { %1814 = vmatpush.bf16.msrb.mxu1 %v3511_v13  ;;  %1783 = vmatmul.bf16.vlgmr.msra.gmra.mxu2 %v4404_v7  ;;  %v3460_v50 = vld [vmem:[#allocation6 + $0x690] sm:$0xf0]  ;;  %v4112_v51 = vld [vmem:[#allocation6 + $0x764] sm:$0xf]  ;;  %v3191_v55 = vor.u32 %v4016_v44, %v3188_v48  ;;  %v3971_v48 = vld [vmem:[#allocation6 + $0x2f4] sm:$0xf0] }
  0x7d   :  { %1828 = vmatpush.bf16.msrb.mxu2 %v1624_v22  ;;  %v3572_v53 = vld [vmem:[#allocation6 + $0x770] sm:$0xf0]  ;;  %v3463_v56 = vor.u32 %v4084_v49, %v3460_v50  ;;  %v4012_v57 = vld [vmem:[#allocation6 + $0x444] sm:$0xf]  ;;  %v2747_v49 = vor.u32 %v3907_v33, %v2746_v32  ;;  %v3935_v50 = vld [vmem:[#allocation6 + $0x1d4] sm:$0xf0] }
  0x7e   :  { %1789 = vmatpush.bf16.msrb.mxu3 %v3239_v12  ;;  %v4048_v58 = vld [vmem:[#allocation6 + $0x564] sm:$0xf]  ;;  %v3316_v59 = vld [vmem:[#allocation6 + $0x570] sm:$0xf0]  ;;  %v3575_v60 = vor.u32 %v4112_v51, %v3572_v53  ;;  %v3130_v51 = vld [vmem:[#allocation6 + $0x3e8] sm:$0xf] }
  0x7f   :  { %1802 = vmatpush.bf16.msrb.mxu0 %v3367_v25  ;;  %v3172_v61 = vld [vmem:[#allocation6 + $0x450] sm:$0xf0]  ;;  %v4080_v62 = vld [vmem:[#allocation6 + $0x664] sm:$0xf]  ;;  %v3319_v2 = vor.u32 %v4048_v58, %v3316_v59  ;;  %v4003_v53 = vld [vmem:[#allocation6 + $0x3f4] sm:$0xf0]  ;;  %v2859_v59 = vor.u32 %v3935_v50, %v2858_v46 }
  0x80   :  { %1815 = vmatpush.bf16.msrb.mxu1 %v3495_v27  ;;  %v3444_v63 = vld [vmem:[#allocation6 + $0x670] sm:$0xf0]  ;;  %v4108_v0 = vld [vmem:[#allocation6 + $0x744] sm:$0xf]  ;;  %v3175_v4 = vor.u32 %v4012_v57, %v3172_v61  ;;  %v2842_v61 = vld [vmem:[#allocation6 + $0x1a8] sm:$0xf] }
  0x81   :  { %1829 = vmatpush.bf16.msrb.mxu2 %v3607_v31  ;;  %v3556_v1 = vld [vmem:[#allocation6 + $0x750] sm:$0xf0]  ;;  %v3447_v20 = vor.u32 %v4080_v62, %v3444_v63  ;;  %v4008_v5 = vld [vmem:[#allocation6 + $0x424] sm:$0xf]  ;;  %v2986_v62 = vld [vmem:[#allocation6 + $0x2c8] sm:$0xf] }
  0x82   :  { %1790 = vmatpush.bf16.msrb.mxu3 %v3223_v26  ;;  %v4044_v6 = vld [vmem:[#allocation6 + $0x544] sm:$0xf]  ;;  %v3300_v8 = vld [vmem:[#allocation6 + $0x550] sm:$0xf0]  ;;  %v3559_v9 = vor.u32 %v4108_v0, %v3556_v1  ;;  %v3967_v63 = vld [vmem:[#allocation6 + $0x2d4] sm:$0xf0] }
  0x83   :  { %1803 = vmatpush.bf16.msrb.mxu0 %v3351_v38  ;;  %v3156_v10 = vld [vmem:[#allocation6 + $0x430] sm:$0xf0]  ;;  %v4076_v11 = vld [vmem:[#allocation6 + $0x644] sm:$0xf]  ;;  %v3303_v15 = vor.u32 %v4044_v6, %v3300_v8  ;;  %v3931_v1 = vld [vmem:[#allocation6 + $0x1b4] sm:$0xf0]  ;;  %v2987_v6 = vor.u32 %v3967_v63, %v2986_v62 }
  0x84   :  { %1816 = vmatpush.bf16.msrb.mxu1 %v3479_v40  ;;  %v3428_v12 = vld [vmem:[#allocation6 + $0x650] sm:$0xf0]  ;;  %v4104_v13 = vld [vmem:[#allocation6 + $0x724] sm:$0xf]  ;;  %v3159_v17 = vor.u32 %v4008_v5, %v3156_v10  ;;  %v3899_v5 = vld [vmem:[#allocation6 + $0xb4] sm:$0xf0]  ;;  %v2843_v8 = vor.u32 %v3931_v1, %v2842_v61 }
  0x85   :  { %1830 = vmatpush.bf16.msrb.mxu2 %v3591_v47  ;;  %v3540_v14 = vld [vmem:[#allocation6 + $0x730] sm:$0xf0]  ;;  %v4004_v16 = vld [vmem:[#allocation6 + $0x404] sm:$0xf]  ;;  %v3431_v18 = vor.u32 %v4076_v11, %v3428_v12  ;;  %v3002_v47 = vld [vmem:[#allocation6 + $0x2e8] sm:$0xf] }
  0x86   :  { %1791 = vmatpush.bf16.msrb.mxu3 %v3207_v39  ;;  %v3140_v21 = vld [vmem:[#allocation6 + $0x410] sm:$0xf0]  ;;  %v4040_v22 = vld [vmem:[#allocation6 + $0x524] sm:$0xf]  ;;  %v3543_v24 = vor.u32 %v4104_v13, %v3540_v14  ;;  %v3003_v58 = vor.u32 %v3971_v48, %v3002_v47  ;;  %v2826_v10 = vld [vmem:[#allocation6 + $0x188] sm:$0xf] }
  0x87   :  { %1804 = vmatpush.bf16.msrb.mxu0 %v3335_v54  ;;  %v3284_v23 = vld [vmem:[#allocation6 + $0x530] sm:$0xf0]  ;;  %v4072_v25 = vld [vmem:[#allocation6 + $0x624] sm:$0xf]  ;;  %v3143_v35 = vor.u32 %v4004_v16, %v3140_v21  ;;  %v2970_v11 = vld [vmem:[#allocation6 + $0x2a8] sm:$0xf] }
  0x88   :  { %1817 = vmatpush.bf16.msrb.mxu1 %v3463_v56  ;;  %v3412_v26 = vld [vmem:[#allocation6 + $0x630] sm:$0xf0]  ;;  %v4100_v27 = vld [vmem:[#allocation6 + $0x704] sm:$0xf]  ;;  %v3287_v31 = vor.u32 %v4040_v22, %v3284_v23  ;;  %v3903_v56 = vld [vmem:[#allocation6 + $0xd4] sm:$0xf0] }
  0x89   :  { %1831 = vmatpush.bf16.msrb.mxu2 %v3575_v60  ;;  %v3524_v28 = vld [vmem:[#allocation6 + $0x710] sm:$0xf0]  ;;  %v4036_v34 = vld [vmem:[#allocation6 + $0x504] sm:$0xf]  ;;  %v3415_v36 = vor.u32 %v4072_v25, %v3412_v26  ;;  %v3131_v60 = vor.u32 %v4003_v53, %v3130_v51  ;;  %v3963_v12 = vld [vmem:[#allocation6 + $0x2b4] sm:$0xf0] }
  0x8a   :  { %1792 = vmatpush.bf16.msrb.mxu3 %v3191_v55  ;;  %v3268_v38 = vld [vmem:[#allocation6 + $0x510] sm:$0xf0]  ;;  %v4068_v39 = vld [vmem:[#allocation6 + $0x604] sm:$0xf]  ;;  %v3527_v44 = vor.u32 %v4100_v27, %v3524_v28  ;;  %v2730_v55 = vld [vmem:[#allocation6 + $0xc8] sm:$0xf]  ;;  %v2971_v21 = vor.u32 %v3963_v12, %v2970_v11 }
  0x8b   :  { %1805 = vmatpush.bf16.msrb.mxu0 %v3319_v2  ;;  %v3396_v40 = vld [vmem:[#allocation6 + $0x610] sm:$0xf0]  ;;  %v3271_v54 = vor.u32 %v4036_v34, %v3268_v38  ;;  %v2731_v0 = vor.u32 %v3903_v56, %v2730_v55  ;;  %v3114_v2 = vld [vmem:[#allocation6 + $0x3c8] sm:$0xf]  ;;  %v3927_v14 = vld [vmem:[#allocation6 + $0x194] sm:$0xf0] }
  0x8c   :  { %1818 = vmatpush.bf16.msrb.mxu1 %v3447_v20  ;;  %v3399_v57 = vor.u32 %v4068_v39, %v3396_v40  ;;  %v2714_v20 = vld [vmem:[#allocation6 + $0xa8] sm:$0xf]  ;;  %v3995_v16 = vld [vmem:[#allocation6 + $0x3b4] sm:$0xf0]  ;;  %v2827_v22 = vor.u32 %v3927_v14, %v2826_v10 }
  0x8d   :  { %1832 = vmatpush.bf16.msrb.mxu2 %v3559_v9  ;;  %v2715_v13 = vor.u32 %v3899_v5, %v2714_v20  ;;  %v2954_v25 = vld [vmem:[#allocation6 + $0x288] sm:$0xf]  ;;  %v3959_v26 = vld [vmem:[#allocation6 + $0x294] sm:$0xf0] }
  0x8e   :  { %1793 = vmatpush.bf16.msrb.mxu3 %v3175_v4  ;;  %v3999_v4 = vld [vmem:[#allocation6 + $0x3d4] sm:$0xf0]  ;;  %v3082_v29 = vld [vmem:[#allocation6 + $0x388] sm:$0xf]  ;;  %v2955_v33 = vor.u32 %v3959_v26, %v2954_v25 }
  0x8f   :  { %1806 = vmatpush.bf16.msrb.mxu0 %v3303_v15  ;;  %v3115_v9 = vor.u32 %v3999_v4, %v3114_v2  ;;  %v3098_v15 = vld [vmem:[#allocation6 + $0x3a8] sm:$0xf]  ;;  %v3923_v28 = vld [vmem:[#allocation6 + $0x174] sm:$0xf0] }
  0x90   :  { %1819 = vmatpush.bf16.msrb.mxu1 %v3431_v18  ;;  %v3895_v18 = vld [vmem:[#allocation6 + $0x94] sm:$0xf0]  ;;  %v3099_v23 = vor.u32 %v3995_v16, %v3098_v15  ;;  %v2938_v38 = vld [vmem:[#allocation6 + $0x268] sm:$0xf] }
  0x91   :  { %1833 = vmatpush.bf16.msrb.mxu2 %v3543_v24  ;;  %v2810_v24 = vld [vmem:[#allocation6 + $0x168] sm:$0xf]  ;;  %v3991_v30 = vld [vmem:[#allocation6 + $0x394] sm:$0xf0] }
  0x92   :  { %1794 = vmatpush.bf16.msrb.mxu3 %v3159_v17  ;;  %v2698_v17 = vld [vmem:[#allocation6 + $0x88] sm:$0xf]  ;;  %v3891_v32 = vld [vmem:[#allocation6 + $0x74] sm:$0xf0]  ;;  %v2811_v34 = vor.u32 %v3923_v28, %v2810_v24 }
  0x93   :  { %1807 = vmatpush.bf16.msrb.mxu0 %v3287_v31  ;;  %v2699_v27 = vor.u32 %v3895_v18, %v2698_v17  ;;  %v2682_v31 = vld [vmem:[#allocation6 + $0x68] sm:$0xf]  ;;  %v3955_v39 = vld [vmem:[#allocation6 + $0x274] sm:$0xf0] }
  0x94   :  { %1820 = vmatpush.bf16.msrb.mxu1 %v3415_v36  ;;  %v2794_v36 = vld [vmem:[#allocation6 + $0x148] sm:$0xf]  ;;  %v2683_v40 = vor.u32 %v3891_v32, %v2682_v31  ;;  %v3987_v46 = vld [vmem:[#allocation6 + $0x374] sm:$0xf0] }
  0x95   :  { %1834 = vmatpush.bf16.msrb.mxu2 %v3527_v44  ;;  %v3919_v44 = vld [vmem:[#allocation6 + $0x154] sm:$0xf0]  ;;  %v2666_v47 = vld [vmem:[#allocation6 + $0x48] sm:$0xf] }
  0x96   :  { %1795 = vmatpush.bf16.msrb.mxu3 %v3143_v35  ;;  %v3083_v35 = vor.u32 %v3991_v30, %v3082_v29  ;;  %v3887_v48 = vld [vmem:[#allocation6 + $0x54] sm:$0xf0]  ;;  %v2778_v50 = vld [vmem:[#allocation6 + $0x128] sm:$0xf]  ;;  %v2795_v51 = vor.u32 %v3919_v44, %v2794_v36 }
  0x97   :  { %1808 = vmatpush.bf16.msrb.mxu0 %v3271_v54  ;;  %v3915_v54 = vld [vmem:[#allocation6 + $0x134] sm:$0xf0]  ;;  %v2922_v55 = vld [vmem:[#allocation6 + $0x248] sm:$0xf] }
  0x98   :  { %1821 = vmatpush.bf16.msrb.mxu1 %v3399_v57  ;;  %3617 = vmatmul.msk.bf16.vlgmr.msrb.gmra.mxu2 %vm1615_vm1, %v4415_v42  ;;  %v3951_v56 = vld [vmem:[#allocation6 + $0x254] sm:$0xf0]  ;;  %v2667_v57 = vor.u32 %v3887_v48, %v2666_v47  ;;  %v2650_v61 = vld [vmem:[#allocation6 + $0x28] sm:$0xf] }
  0x99   :  { %1840 = vmatpush.bf16.msra.mxu2 %v2747_v49  ;;  %1796 = vmatmul.bf16.vlgmr.msrb.gmra.mxu3 %v4413_v41  ;;  %v2939_v49 = vor.u32 %v3955_v39, %v2938_v38  ;;  %v3883_v62 = vld [vmem:[#allocation6 + $0x34] sm:$0xf0]  ;;  %v2923_v63 = vor.u32 %v3951_v56, %v2922_v55  ;;  %v2634_v2 = vld [vmem:[#allocation6 + $0x8] sm:$0xf] }
  0x9a   :  { %1853 = vmatpush.bf16.msra.mxu3 %v2875_v45  ;;  %1809 = vmatmul.bf16.vlgmr.msrb.gmra.mxu0 %v4417_v43  ;;  %v3066_v45 = vld [vmem:[#allocation6 + $0x368] sm:$0xf]  ;;  %v3947_v5 = vld [vmem:[#allocation6 + $0x234] sm:$0xf0] }
  0x9b   :  { %1866 = vmatpush.bf16.msra.mxu0 %v3003_v58  ;;  %1822 = vmatmul.bf16.vlgmr.msrb.gmra.mxu1 %v4411_v37  ;;  %v3067_v53 = vor.u32 %v3987_v46, %v3066_v45  ;;  %v3050_v58 = vld [vmem:[#allocation6 + $0x348] sm:$0xf]  ;;  %v3979_v11 = vld [vmem:[#allocation6 + $0x334] sm:$0xf0] }
  0x9c   :  { %1879 = vmatpush.bf16.msra.mxu1 %v3131_v60  ;;  %v4435_v60 = vld [vmem:[#allocation6 + $0x7c8] sm:$0xff]  ;;  %v3879_v12 = vld [vmem:[#allocation6 + $0x14] sm:$0xf0] }
  0x9d   :  { %1841 = vmatpush.bf16.msra.mxu2 %v2731_v0  ;;  %v2779_v0 = vor.u32 %v3915_v54, %v2778_v50  ;;  %v2762_v4 = vld [vmem:[#allocation6 + $0x108] sm:$0xf]  ;;  %v4067_v14 = vld [vmem:[#allocation6 + $0x5f4] sm:$0xf0]  ;;  %v2635_v26 = vor.u32 %v3879_v12, %v2634_v2 }
  0x9e   :  { %1854 = vmatpush.bf16.msra.mxu3 %v2859_v59  ;;  %v3983_v59 = vld [vmem:[#allocation6 + $0x354] sm:$0xf0]  ;;  %v2906_v20 = vld [vmem:[#allocation6 + $0x228] sm:$0xf] }
  0x9f   :  { %1867 = vmatpush.bf16.msra.mxu0 %v2987_v6  ;;  %v3051_v1 = vor.u32 %v3983_v59, %v3050_v58  ;;  %v1113_v6 = vunpack.c.l.b16 %v4435_v60  ;;  %v3034_v10 = vld [vmem:[#allocation6 + $0x328] sm:$0xf]  ;;  %v2907_v15 = vor.u32 %v3947_v5, %v2906_v20  ;;  %v4035_v17 = vld [vmem:[#allocation6 + $0x4f4] sm:$0xf0] }
  0xa0   :  { %1880 = vmatpush.bf16.msra.mxu1 %v3115_v9  ;;  %v3911_v9 = vld [vmem:[#allocation6 + $0x114] sm:$0xf0]  ;;  %v3258_v16 = vld [vmem:[#allocation6 + $0x4e8] sm:$0xf] }
  0xa1   :  { %1842 = vmatpush.bf16.msra.mxu2 %v2715_v13  ;;  %v3386_v13 = vld [vmem:[#allocation6 + $0x5e8] sm:$0xf]  ;;  %v2763_v18 = vor.u32 %v3911_v9, %v2762_v4  ;;  %v1365_v25 = vpack.c.b16 %v1113_v6, %v1113_v6  ;;  %v3975_v28 = vld [vmem:[#allocation6 + $0x314] sm:$0xf0]  ;;  %v3259_v31 = vor.u32 %v4035_v17, %v3258_v16 }
  0xa2   :  { %1855 = vmatpush.bf16.msra.mxu3 %v2843_v8  ;;  %v2651_v8 = vor.u32 %v3883_v62, %v2650_v61  ;;  %v3018_v24 = vld [vmem:[#allocation6 + $0x308] sm:$0xf]  ;;  %v4099_v30 = vld [vmem:[#allocation6 + $0x6f4] sm:$0xf0] }
  0xa3   :  { %1868 = vmatpush.bf16.msra.mxu0 %v2971_v21  ;;  %v3035_v21 = vor.u32 %v3979_v11, %v3034_v10  ;;  %v3514_v29 = vld [vmem:[#allocation6 + $0x6e8] sm:$0xf]  ;;  %v4031_v36 = vld [vmem:[#allocation6 + $0x4d4] sm:$0xf0]  ;;  %v3019_v38 = vor.u32 %v3975_v28, %v3018_v24 }
  0xa4   :  { %1881 = vmatpush.bf16.msra.mxu1 %v3099_v23  ;;  %v3943_v23 = vld [vmem:[#allocation6 + $0x214] sm:$0xf0]  ;;  %v3370_v32 = vld [vmem:[#allocation6 + $0x5c8] sm:$0xf]  ;;  %v3515_v39 = vor.u32 %v4099_v30, %v3514_v29 }
  0xa5   :  { %1843 = vmatpush.bf16.msra.mxu2 %v2699_v27  ;;  %v3387_v27 = vor.u32 %v4067_v14, %v3386_v13  ;;  %v3354_v45 = vld [vmem:[#allocation6 + $0x5a8] sm:$0xf]  ;;  %v4095_v47 = vld [vmem:[#allocation6 + $0x6d4] sm:$0xf0] }
  0xa6   :  { %1856 = vmatpush.bf16.msra.mxu3 %v2827_v22  ;;  %v2890_v22 = vld [vmem:[#allocation6 + $0x208] sm:$0xf]  ;;  %v4027_v54 = vld [vmem:[#allocation6 + $0x4b4] sm:$0xf0] }
  0xa7   :  { %1869 = vmatpush.bf16.msra.mxu0 %v2955_v33  ;;  %v4063_v33 = vld [vmem:[#allocation6 + $0x5d4] sm:$0xf0]  ;;  %v3498_v46 = vld [vmem:[#allocation6 + $0x6c8] sm:$0xf] }
  0xa8   :  { %1882 = vmatpush.bf16.msra.mxu1 %v3083_v35  ;;  %v3242_v35 = vld [vmem:[#allocation6 + $0x4c8] sm:$0xf]  ;;  %v3371_v44 = vor.u32 %v4063_v33, %v3370_v32  ;;  %v3499_v55 = vor.u32 %v4095_v47, %v3498_v46  ;;  %v4091_v61 = vld [vmem:[#allocation6 + $0x6b4] sm:$0xf0] }
  0xa9   :  { %1844 = vmatpush.bf16.msra.mxu2 %v2683_v40  ;;  %v1627_v40 = vsel %vm1619_vm0, %v1365_v25, 0  ;;  %v3243_v48 = vor.u32 %v4031_v36, %v3242_v35  ;;  %v3610_v50 = vld [vmem:[#allocation6 + $0x7a8] sm:$0xf]  ;;  %v4023_v4 = vld [vmem:[#allocation6 + $0x494] sm:$0xf0] }
  0xaa   :  { %1857 = vmatpush.bf16.msra.mxu3 %v2811_v34  ;;  %v2891_v34 = vor.u32 %v3943_v23, %v2890_v22  ;;  %v3338_v58 = vld [vmem:[#allocation6 + $0x588] sm:$0xf]  ;;  %v4087_v10 = vld [vmem:[#allocation6 + $0x694] sm:$0xf0] }
  0xab   :  { %1870 = vmatpush.bf16.msra.mxu0 %v2939_v49  ;;  %v4059_v49 = vld [vmem:[#allocation6 + $0x5b4] sm:$0xf0]  ;;  %v3482_v59 = vld [vmem:[#allocation6 + $0x6a8] sm:$0xf] }
  0xac   :  { %1883 = vmatpush.bf16.msra.mxu1 %v3067_v53  ;;  %v3226_v53 = vld [vmem:[#allocation6 + $0x4a8] sm:$0xf]  ;;  %v3355_v56 = vor.u32 %v4059_v49, %v3354_v45  ;;  %v3483_v20 = vor.u32 %v4091_v61, %v3482_v59  ;;  %v4051_v12 = vld [vmem:[#allocation6 + $0x574] sm:$0xf0] }
  0xad   :  { %1845 = vmatpush.bf16.msra.mxu2 %v2667_v57  ;;  %v3227_v62 = vor.u32 %v4027_v54, %v3226_v53  ;;  %v3210_v2 = vld [vmem:[#allocation6 + $0x488] sm:$0xf]  ;;  %v4115_v14 = vld [vmem:[#allocation6 + $0x774] sm:$0xf0] }
  0xae   :  { %1858 = vmatpush.bf16.msra.mxu3 %v2795_v51  ;;  %v4123_v51 = vld [vmem:[#allocation6 + $0x7b4] sm:$0xf0]  ;;  %v3466_v9 = vld [vmem:[#allocation6 + $0x688] sm:$0xf]  ;;  %v3211_v11 = vor.u32 %v4023_v4, %v3210_v2 }
  0xaf   :  { %1871 = vmatpush.bf16.msra.mxu0 %v2923_v63  ;;  %v3611_v57 = vor.u32 %v4123_v51, %v3610_v50  ;;  %v4055_v63 = vld [vmem:[#allocation6 + $0x594] sm:$0xf0]  ;;  %v3578_v13 = vld [vmem:[#allocation6 + $0x768] sm:$0xf]  ;;  %v3467_v17 = vor.u32 %v4087_v10, %v3466_v9  ;;  %v2876_v10 = vld [vmem:[#allocation6 + $0x1f8] sm:$0xf0] }
  0xb0   :  { %1884 = vmatpush.bf16.msra.mxu1 %v3051_v1  ;;  %v4119_v1 = vld [vmem:[#allocation6 + $0x794] sm:$0xf0]  ;;  %v3339_v5 = vor.u32 %v4055_v63, %v3338_v58  ;;  %v3579_v22 = vor.u32 %v4115_v14, %v3578_v13  ;;  %v3306_v23 = vld [vmem:[#allocation6 + $0x548] sm:$0xf] }
  0xb1   :  { %1846 = vmatpush.bf16.msra.mxu2 %v2651_v8  ;;  %v3322_v8 = vld [vmem:[#allocation6 + $0x568] sm:$0xf]  ;;  %v4019_v16 = vld [vmem:[#allocation6 + $0x474] sm:$0xf0] }
  0xb2   :  { %1859 = vmatpush.bf16.msra.mxu3 %v2779_v0  ;;  %v3594_v0 = vld [vmem:[#allocation6 + $0x788] sm:$0xf]  ;;  %v4083_v25 = vld [vmem:[#allocation6 + $0x674] sm:$0xf0] }
  0xb3   :  { %1872 = vmatpush.bf16.msra.mxu0 %v2907_v15  ;;  %v3595_v6 = vor.u32 %v4119_v1, %v3594_v0  ;;  %v3194_v15 = vld [vmem:[#allocation6 + $0x468] sm:$0xf]  ;;  %v4111_v29 = vld [vmem:[#allocation6 + $0x754] sm:$0xf0] }
  0xb4   :  { %1885 = vmatpush.bf16.msra.mxu1 %v3035_v21  ;;  %v3323_v21 = vor.u32 %v4051_v12, %v3322_v8  ;;  %v3450_v24 = vld [vmem:[#allocation6 + $0x668] sm:$0xf]  ;;  %v4107_v46 = vld [vmem:[#allocation6 + $0x734] sm:$0xf0]  ;;  %v3004_v12 = vld [vmem:[#allocation6 + $0x2f8] sm:$0xf0] }
  0xb5   :  { %1847 = vmatpush.bf16.msra.mxu2 %v2635_v26  ;;  %v3195_v26 = vor.u32 %v4019_v16, %v3194_v15  ;;  %v3562_v28 = vld [vmem:[#allocation6 + $0x748] sm:$0xf]  ;;  %v3451_v33 = vor.u32 %v4083_v25, %v3450_v24  ;;  %v4011_v49 = vld [vmem:[#allocation6 + $0x434] sm:$0xf0]  ;;  %v3132_v24 = vld [vmem:[#allocation6 + $0x3f8] sm:$0xf0] }
  0xb6   :  { %1860 = vmatpush.bf16.msra.mxu3 %v2763_v18  ;;  %v4443_v18 = vld [vmem:[#allocation8] sm:$0xf]  ;;  %v3178_v30 = vld [vmem:[#allocation6 + $0x448] sm:$0xf]  ;;  %v3563_v35 = vor.u32 %v4111_v29, %v3562_v28  ;;  %v4007_v58 = vld [vmem:[#allocation6 + $0x414] sm:$0xf0] }
  0xb7   :  { %1873 = vmatpush.bf16.msra.mxu0 %v2891_v34  ;;  %v357_v32 = vperm.slane %v4443_v18, 0  ;;  %v3290_v36 = vld [vmem:[#allocation6 + $0x528] sm:$0xf]  ;;  %v4039_v1 = vld [vmem:[#allocation6 + $0x514] sm:$0xf0] }
  0xb8   :  { %1886 = vmatpush.bf16.msra.mxu1 %v3019_v38  ;;  %1848 = vmatmul.bf16.vlgmr.msra.gmra.mxu2 %v4402_v3  ;;  %v3434_v38 = vld [vmem:[#allocation6 + $0x648] sm:$0xf]  ;;  %v1654_v53 = vpop.f32.mrf.mxu1  ;;  %v4103_v4 = vld [vmem:[#allocation6 + $0x714] sm:$0xf0]  ;;  %v3901_v29 = vld [vmem:[#allocation6 + $0xcc] sm:$0xf] }
  0xb9   :  { %1892 = vmatpush.bf16.msrb.mxu2 %v3259_v31  ;;  %1861 = vmatmul.bf16.vlgmr.msra.gmra.mxu3 %v4407_v19  ;;  %v4015_v31 = vld [vmem:[#allocation6 + $0x454] sm:$0xf0]  ;;  %v3546_v45 = vld [vmem:[#allocation6 + $0x728] sm:$0xf] }
  0xba   :  { %1905 = vmatpush.bf16.msrb.mxu3 %v3387_v27  ;;  %1874 = vmatmul.bf16.vlgmr.msra.gmra.mxu0 %v4398_v52  ;;  %v4047_v27 = vld [vmem:[#allocation6 + $0x554] sm:$0xf0]  ;;  %v3274_v59 = vld [vmem:[#allocation6 + $0x508] sm:$0xf] }
  0xbb   :  { %1918 = vmatpush.bf16.msrb.mxu0 %v3515_v39  ;;  %1887 = vmatmul.bf16.vlgmr.msra.gmra.mxu1 %v4404_v7  ;;  %v3307_v34 = vor.u32 %v4047_v27, %v3306_v23  ;;  %v4079_v39 = vld [vmem:[#allocation6 + $0x654] sm:$0xf0]  ;;  %v3418_v61 = vld [vmem:[#allocation6 + $0x628] sm:$0xf]  ;;  %v3275_v13 = vor.u32 %v4039_v1, %v3274_v59  ;;  %v4001_v23 = vld [vmem:[#allocation6 + $0x3ec] sm:$0xf] }
  0xbc   :  { %1932 = vmatpush.bf16.msrb.mxu1 %v1627_v40  ;;  %v3179_v40 = vor.u32 %v4015_v31, %v3178_v30  ;;  %v3435_v51 = vor.u32 %v4079_v39, %v3434_v38  ;;  %v3530_v2 = vld [vmem:[#allocation6 + $0x708] sm:$0xf]  ;;  %v4071_v16 = vld [vmem:[#allocation6 + $0x614] sm:$0xf0]  ;;  %v2732_v30 = vld [vmem:[#allocation6 + $0xd8] sm:$0xf0]  ;;  %v3135_v39 = vor.u32 %v4001_v23, %v3132_v24 }
  0xbd   :  { %1893 = vmatpush.bf16.msrb.mxu2 %v3243_v48  ;;  %v3162_v48 = vld [vmem:[#allocation6 + $0x428] sm:$0xf]  ;;  %v3531_v14 = vor.u32 %v4103_v4, %v3530_v2  ;;  %v3933_v31 = vld [vmem:[#allocation6 + $0x1cc] sm:$0xf]  ;;  %v3100_v59 = vld [vmem:[#allocation6 + $0x3b8] sm:$0xf0] }
  0xbe   :  { %1906 = vmatpush.bf16.msrb.mxu3 %v3371_v44  ;;  %v4043_v44 = vld [vmem:[#allocation6 + $0x534] sm:$0xf0]  ;;  %v3163_v0 = vor.u32 %v4011_v49, %v3162_v48  ;;  %v3402_v15 = vld [vmem:[#allocation6 + $0x608] sm:$0xf]  ;;  %v3897_v48 = vld [vmem:[#allocation6 + $0xac] sm:$0xf] }
  0xbf   :  { %1919 = vmatpush.bf16.msrb.mxu0 %v3499_v55  ;;  %v3291_v55 = vor.u32 %v4043_v44, %v3290_v36  ;;  %v3997_v44 = vld [vmem:[#allocation6 + $0x3cc] sm:$0xf]  ;;  %v2716_v49 = vld [vmem:[#allocation6 + $0xb8] sm:$0xf0] }
  0xc0   :  { %1933 = vmatpush.bf16.msrb.mxu1 %v3611_v57  ;;  %v3146_v57 = vld [vmem:[#allocation6 + $0x408] sm:$0xf]  ;;  %v1656_v36 = vpop.f32.mrf.mxu1  ;;  %v3925_v1 = vld [vmem:[#allocation6 + $0x18c] sm:$0xf]  ;;  %v2828_v2 = vld [vmem:[#allocation6 + $0x198] sm:$0xf0] }
  0xc1   :  { %1894 = vmatpush.bf16.msrb.mxu2 %v3227_v62  ;;  %v1641_v47 = vpop.f32.mrf.mxu0  ;;  %v1667_v54 = vpop.f32.mrf.mxu2  ;;  %v4075_v62 = vld [vmem:[#allocation6 + $0x634] sm:$0xf0]  ;;  %v3957_v4 = vld [vmem:[#allocation6 + $0x28c] sm:$0xf]  ;;  %v3068_v24 = vld [vmem:[#allocation6 + $0x378] sm:$0xf0] }
  0xc2   :  { %1907 = vmatpush.bf16.msrb.mxu3 %v3355_v56  ;;  %v1642_v50 = vadd.f32 %v1641_v47, %v357_v32  ;;  %v3547_v56 = vor.u32 %v4107_v46, %v3546_v45  ;;  %v3419_v9 = vor.u32 %v4075_v62, %v3418_v61  ;;  %v3403_v32 = vor.u32 %v4071_v16, %v3402_v15  ;;  %v3116_v45 = vld [vmem:[#allocation6 + $0x3d8] sm:$0xf0]  ;;  %v3953_v16 = vld [vmem:[#allocation6 + $0x26c] sm:$0xf] }
  0xc3   :  { %1920 = vmatpush.bf16.msrb.mxu0 %v3483_v20  ;;  %v3905_v20 = vld [vmem:[#allocation6 + $0xec] sm:$0xf]  ;;  %v2812_v15 = vld [vmem:[#allocation6 + $0x178] sm:$0xf0] }
  0xc4   :  { %1934 = vmatpush.bf16.msrb.mxu1 %v3595_v6  ;;  %v1655_v63 = vadd.f32 %v1654_v53, %v1642_v50  ;;  %v3937_v6 = vld [vmem:[#allocation6 + $0x1ec] sm:$0xf] }
  0xc5   :  { %1895 = vmatpush.bf16.msrb.mxu2 %v3211_v11  ;;  %v3969_v11 = vld [vmem:[#allocation6 + $0x2ec] sm:$0xf]  ;;  %v2879_v27 = vor.u32 %v3937_v6, %v2876_v10  ;;  %v2831_v10 = vor.u32 %v3925_v1, %v2828_v2  ;;  %v2764_v1 = vld [vmem:[#allocation6 + $0x118] sm:$0xf0] }
  0xc6   :  { %1908 = vmatpush.bf16.msrb.mxu3 %v3339_v5  ;;  %v2748_v5 = vld [vmem:[#allocation6 + $0xf8] sm:$0xf0]  ;;  %v1668_v8 = vadd.f32 %v1667_v54, %v1655_v63  ;;  %v3007_v28 = vor.u32 %v3969_v11, %v3004_v12  ;;  %v3929_v50 = vld [vmem:[#allocation6 + $0x1ac] sm:$0xf] }
  0xc7   :  { %1921 = vmatpush.bf16.msrb.mxu0 %v3467_v17  ;;  %v1680_v17 = vpop.f32.mrf.mxu3  ;;  %v3961_v53 = vld [vmem:[#allocation6 + $0x2ac] sm:$0xf]  ;;  %v2972_v54 = vld [vmem:[#allocation6 + $0x2b8] sm:$0xf0] }
  0xc8   :  { %1935 = vmatpush.bf16.msrb.mxu1 %v3579_v22  ;;  %v2751_v22 = vor.u32 %v3905_v20, %v2748_v5  ;;  %v4446_v25 = vadd.f32 %v1680_v17, %v1668_v8  ;;  %v2975_v62 = vor.u32 %v3961_v53, %v2972_v54  ;;  %v3893_v63 = vld [vmem:[#allocation6 + $0x8c] sm:$0xf]  ;;  %v2956_v20 = vld [vmem:[#allocation6 + $0x298] sm:$0xf0] }
  0xc9   :  { %1896 = vmatpush.bf16.msrb.mxu2 %v3195_v26  ;;  %v1643_v26 = vpop.f32.mrf.mxu0  ;;  %v1669_v38 = vpop.f32.mrf.mxu2  ;;  %v3989_v8 = vld [vmem:[#allocation6 + $0x38c] sm:$0xf]  ;;  %v2959_v11 = vor.u32 %v3957_v4, %v2956_v20  ;;  %v2940_v17 = vld [vmem:[#allocation6 + $0x278] sm:$0xf0]  ;;  %v1114_v4 = vunpack.c.h.b16 %v4435_v60 }
  0xca   :  { %1909 = vmatpush.bf16.msrb.mxu3 %v3323_v21  ;;  %v3147_v21 = vor.u32 %v4007_v58, %v3146_v57  ;;  %v2719_v57 = vor.u32 %v3897_v48, %v2716_v49  ;;  %v3993_v58 = vld [vmem:[#allocation6 + $0x3ac] sm:$0xf]  ;;  %v2780_v49 = vld [vmem:[#allocation6 + $0x138] sm:$0xf0] }
  0xcb   :  { %1922 = vmatpush.bf16.msrb.mxu0 %v3451_v33  ;;  %v2860_v33 = vld [vmem:[#allocation6 + $0x1d8] sm:$0xf0]  ;;  %v3103_v5 = vor.u32 %v3993_v58, %v3100_v59  ;;  %v3889_v12 = vld [vmem:[#allocation6 + $0x6c] sm:$0xf]  ;;  %v1366_v60 = vpack.c.b16 %v1114_v4, %v1114_v4 }
  0xcc   :  { %1936 = vmatpush.bf16.msrb.mxu1 %v3563_v35  ;;  %v2988_v35 = vld [vmem:[#allocation6 + $0x2d8] sm:$0xf0]  ;;  %v2863_v46 = vor.u32 %v3933_v31, %v2860_v33  ;;  %v3985_v23 = vld [vmem:[#allocation6 + $0x36c] sm:$0xf] }
  0xcd   :  { %1897 = vmatpush.bf16.msrb.mxu2 %v3179_v40  ;;  %v2735_v40 = vor.u32 %v3901_v29, %v2732_v30  ;;  %v2668_v29 = vld [vmem:[#allocation6 + $0x58] sm:$0xf0]  ;;  %v3917_v30 = vld [vmem:[#allocation6 + $0x14c] sm:$0xf] }
  0xce   :  { %1910 = vmatpush.bf16.msrb.mxu3 %v3307_v34  ;;  %v3965_v34 = vld [vmem:[#allocation6 + $0x2cc] sm:$0xf]  ;;  %v3036_v59 = vld [vmem:[#allocation6 + $0x338] sm:$0xf0] }
  0xcf   :  { %1923 = vmatpush.bf16.msrb.mxu0 %v3435_v51  ;;  %v2991_v47 = vor.u32 %v3965_v34, %v2988_v35  ;;  %v2844_v51 = vld [vmem:[#allocation6 + $0x1b8] sm:$0xf0]  ;;  %v3949_v33 = vld [vmem:[#allocation6 + $0x24c] sm:$0xf]  ;;  %v3071_v35 = vor.u32 %v3985_v23, %v3068_v24 }
  0xd0   :  { %1937 = vmatpush.bf16.msrb.mxu1 %v3547_v56  ;;  %v1682_v56 = vpop.f32.mrf.mxu3  ;;  %v2847_v61 = vor.u32 %v3929_v50, %v2844_v51  ;;  %v2924_v34 = vld [vmem:[#allocation6 + $0x258] sm:$0xf0]  ;;  %v3913_v48 = vld [vmem:[#allocation6 + $0x12c] sm:$0xf] }
  0xd1   :  { %1898 = vmatpush.bf16.msrb.mxu2 %v3163_v0  ;;  %v2700_v0 = vld [vmem:[#allocation6 + $0x98] sm:$0xf0]  ;;  %v3945_v50 = vld [vmem:[#allocation6 + $0x22c] sm:$0xf] }
  0xd2   :  { %1911 = vmatpush.bf16.msrb.mxu3 %v3291_v55  ;;  %v3119_v55 = vor.u32 %v3997_v44, %v3116_v45  ;;  %v2703_v6 = vor.u32 %v3893_v63, %v2700_v0  ;;  %v2927_v45 = vor.u32 %v3949_v33, %v2924_v34  ;;  %v2908_v51 = vld [vmem:[#allocation6 + $0x238] sm:$0xf0]  ;;  %v3877_v54 = vld [vmem:[#allocation6 + $0xc] sm:$0xf] }
  0xd3   :  { %1924 = vmatpush.bf16.msrb.mxu0 %v3419_v9  ;;  %v3084_v9 = vld [vmem:[#allocation6 + $0x398] sm:$0xf0]  ;;  %v3977_v58 = vld [vmem:[#allocation6 + $0x32c] sm:$0xf] }
  0xd4   :  { %1938 = vmatpush.bf16.msrb.mxu1 %v3531_v14  ;;  %v3921_v14 = vld [vmem:[#allocation6 + $0x16c] sm:$0xf]  ;;  %v2892_v20 = vld [vmem:[#allocation6 + $0x218] sm:$0xf0] }
  0xd5   :  { %1899 = vmatpush.bf16.msrb.mxu2 %v3147_v21  ;;  %v3087_v21 = vor.u32 %v3989_v8, %v3084_v9  ;;  %v2815_v26 = vor.u32 %v3921_v14, %v2812_v15  ;;  %v3909_v0 = vld [vmem:[#allocation6 + $0x10c] sm:$0xf]  ;;  %v3039_v9 = vor.u32 %v3977_v58, %v3036_v59  ;;  %v3516_v15 = vld [vmem:[#allocation6 + $0x6f8] sm:$0xf0] }
  0xd6   :  { %1912 = vmatpush.bf16.msrb.mxu3 %v3275_v13  ;;  %v2684_v13 = vld [vmem:[#allocation6 + $0x78] sm:$0xf0]  ;;  %v3941_v2 = vld [vmem:[#allocation6 + $0x20c] sm:$0xf] }
  0xd7   :  { %1925 = vmatpush.bf16.msrb.mxu0 %v3403_v32  ;;  %3618 = vmatmul.msk.bf16.vlgmr.msrb.gmra.mxu1 %vm1615_vm1, %v4415_v42  ;;  %v4453_v31 = vpop.f32.mrf.mxu0  ;;  %v2796_v32 = vld [vmem:[#allocation6 + $0x158] sm:$0xf0]  ;;  %v4093_v33 = vld [vmem:[#allocation6 + $0x6cc] sm:$0xf] }
  0xd8   :  { %1944 = vmatpush.bf16.msra.mxu1 %v2751_v22  ;;  %1900 = vmatmul.bf16.vlgmr.msrb.gmra.mxu2 %v4413_v41  ;;  %v2687_v22 = vor.u32 %v3889_v12, %v2684_v13  ;;  %v4455_v36 = vpop.f32.mrf.mxu1  ;;  %v2799_v44 = vor.u32 %v3917_v30, %v2796_v32  ;;  %v4097_v12 = vld [vmem:[#allocation6 + $0x6ec] sm:$0xf]  ;;  %v3372_v32 = vld [vmem:[#allocation6 + $0x5d8] sm:$0xf0] }
  0xd9   :  { %1957 = vmatpush.bf16.msra.mxu2 %v2879_v27  ;;  %1913 = vmatmul.bf16.vlgmr.msrb.gmra.mxu3 %v4417_v43  ;;  %v2943_v27 = vor.u32 %v3953_v16, %v2940_v17  ;;  %v3973_v16 = vld [vmem:[#allocation6 + $0x30c] sm:$0xf]  ;;  %v3020_v17 = vld [vmem:[#allocation6 + $0x318] sm:$0xf0] }
  0xda   :  { %1970 = vmatpush.bf16.msra.mxu3 %v3007_v28  ;;  %1926 = vmatmul.bf16.vlgmr.msrb.gmra.mxu0 %v4411_v37  ;;  %v3885_v28 = vld [vmem:[#allocation6 + $0x4c] sm:$0xf]  ;;  %v3500_v34 = vld [vmem:[#allocation6 + $0x6d8] sm:$0xf0] }
  0xdb   :  { %1983 = vmatpush.bf16.msra.mxu0 %v3135_v39  ;;  %v2671_v38 = vor.u32 %v3885_v28, %v2668_v29  ;;  %v3981_v39 = vld [vmem:[#allocation6 + $0x34c] sm:$0xf]  ;;  %v3023_v28 = vor.u32 %v3973_v16, %v3020_v17  ;;  %v3244_v29 = vld [vmem:[#allocation6 + $0x4d8] sm:$0xf0] }
  0xdc   :  { %1945 = vmatpush.bf16.msra.mxu1 %v2735_v40  ;;  %v3052_v40 = vld [vmem:[#allocation6 + $0x358] sm:$0xf0]  ;;  %v4459_v63 = vpop.f32.mrf.mxu3  ;;  %v4061_v30 = vld [vmem:[#allocation6 + $0x5cc] sm:$0xf] }
  0xdd   :  { %1958 = vmatpush.bf16.msra.mxu2 %v2863_v46  ;;  %v3881_v46 = vld [vmem:[#allocation6 + $0x2c] sm:$0xf]  ;;  %v3055_v53 = vor.u32 %v3981_v39, %v3052_v40  ;;  %v3612_v40 = vld [vmem:[#allocation6 + $0x7b8] sm:$0xf0] }
  0xde   :  { %1971 = vmatpush.bf16.msra.mxu3 %v2991_v47  ;;  %v2652_v47 = vld [vmem:[#allocation6 + $0x38] sm:$0xf0]  ;;  %v4121_v39 = vld [vmem:[#allocation6 + $0x7ac] sm:$0xf] }
  0xdf   :  { %1984 = vmatpush.bf16.msra.mxu0 %v3119_v55  ;;  %v4457_v55 = vpop.f32.mrf.mxu2  ;;  %v2655_v56 = vor.u32 %v3881_v46, %v2652_v47  ;;  %v1695_v8 = vpop.f32.mrf.mxu0  ;;  %v3375_v46 = vor.u32 %v4061_v30, %v3372_v32  ;;  %v4025_v47 = vld [vmem:[#allocation6 + $0x4ac] sm:$0xf]  ;;  %v3596_v58 = vld [vmem:[#allocation6 + $0x798] sm:$0xf0] }
  0xe0   :  { %1946 = vmatpush.bf16.msra.mxu1 %v2719_v57  ;;  %v2636_v57 = vld [vmem:[#allocation6 + $0x18] sm:$0xf0]  ;;  %v1708_v13 = vpop.f32.mrf.mxu1  ;;  %v4109_v16 = vld [vmem:[#allocation6 + $0x74c] sm:$0xf] }
  0xe1   :  { %1959 = vmatpush.bf16.msra.mxu2 %v2847_v61  ;;  %v2783_v61 = vor.u32 %v3913_v48, %v2780_v49  ;;  %v2639_v14 = vor.u32 %v3877_v54, %v2636_v57  ;;  %v3503_v48 = vor.u32 %v4093_v33, %v3500_v34  ;;  %v3228_v49 = vld [vmem:[#allocation6 + $0x4b8] sm:$0xf0]  ;;  %v4117_v57 = vld [vmem:[#allocation6 + $0x78c] sm:$0xf] }
  0xe2   :  { %1972 = vmatpush.bf16.msra.mxu3 %v2975_v62  ;;  %v2911_v62 = vor.u32 %v3945_v50, %v2908_v51  ;;  %v4057_v50 = vld [vmem:[#allocation6 + $0x5ac] sm:$0xf]  ;;  %v3356_v51 = vld [vmem:[#allocation6 + $0x5b8] sm:$0xf0]  ;;  %v3231_v59 = vor.u32 %v4025_v47, %v3228_v49 }
  0xe3   :  { %1985 = vmatpush.bf16.msra.mxu0 %v3103_v5  ;;  %v4033_v5 = vld [vmem:[#allocation6 + $0x4ec] sm:$0xf]  ;;  %v3484_v54 = vld [vmem:[#allocation6 + $0x6b8] sm:$0xf0] }
  0xe4   :  { %1947 = vmatpush.bf16.msra.mxu1 %v2703_v6  ;;  %v3260_v6 = vld [vmem:[#allocation6 + $0x4f8] sm:$0xf0]  ;;  %v4105_v33 = vld [vmem:[#allocation6 + $0x72c] sm:$0xf] }
  0xe5   :  { %1960 = vmatpush.bf16.msra.mxu2 %v2831_v10  ;;  %v4065_v10 = vld [vmem:[#allocation6 + $0x5ec] sm:$0xf]  ;;  %v3263_v23 = vor.u32 %v4033_v5, %v3260_v6  ;;  %v3340_v4 = vld [vmem:[#allocation6 + $0x598] sm:$0xf0] }
  0xe6   :  { %1973 = vmatpush.bf16.msra.mxu3 %v2959_v11  ;;  %v3388_v11 = vld [vmem:[#allocation6 + $0x5f8] sm:$0xf0]  ;;  %v4113_v5 = vld [vmem:[#allocation6 + $0x76c] sm:$0xf] }
  0xe7   :  { %1986 = vmatpush.bf16.msra.mxu0 %v3087_v21  ;;  %v2767_v21 = vor.u32 %v3909_v0, %v2764_v1  ;;  %v3391_v24 = vor.u32 %v4065_v10, %v3388_v11  ;;  %v3212_v1 = vld [vmem:[#allocation6 + $0x498] sm:$0xf0] }
  0xe8   :  { %1948 = vmatpush.bf16.msra.mxu1 %v2687_v22  ;;  %v2895_v22 = vor.u32 %v3941_v2, %v2892_v20  ;;  %v4053_v2 = vld [vmem:[#allocation6 + $0x58c] sm:$0xf]  ;;  %v3468_v20 = vld [vmem:[#allocation6 + $0x698] sm:$0xf0] }
  0xe9   :  { %1961 = vmatpush.bf16.msra.mxu2 %v2815_v26  ;;  %v4029_v26 = vld [vmem:[#allocation6 + $0x4cc] sm:$0xf]  ;;  %v3343_v8 = vor.u32 %v4053_v2, %v3340_v4  ;;  %v3196_v11 = vld [vmem:[#allocation6 + $0x478] sm:$0xf0] }
  0xea   :  { %1974 = vmatpush.bf16.msra.mxu3 %v2943_v27  ;;  %v3519_v27 = vor.u32 %v4097_v12, %v3516_v15  ;;  %v4049_v12 = vld [vmem:[#allocation6 + $0x56c] sm:$0xf]  ;;  %v3324_v13 = vld [vmem:[#allocation6 + $0x578] sm:$0xf0] }
  0xeb   :  { %1987 = vmatpush.bf16.msra.mxu0 %v3071_v35  ;;  %v1721_v35 = vpop.f32.mrf.mxu2  ;;  %v3452_v15 = vld [vmem:[#allocation6 + $0x678] sm:$0xf0]  ;;  %v4037_v2 = vld [vmem:[#allocation6 + $0x50c] sm:$0xf] }
  0xec   :  { %1949 = vmatpush.bf16.msra.mxu1 %v2671_v38  ;;  %v1630_v38 = vsel %vm1619_vm0, %v1366_v60, 0  ;;  %v3564_v17 = vld [vmem:[#allocation6 + $0x758] sm:$0xf0]  ;;  %v4013_v60 = vld [vmem:[#allocation6 + $0x44c] sm:$0xf] }
  0xed   :  { %1962 = vmatpush.bf16.msra.mxu2 %v2799_v44  ;;  %v1734_v44 = vpop.f32.mrf.mxu3  ;;  %v3567_v30 = vor.u32 %v4109_v16, %v3564_v17  ;;  %v3548_v34 = vld [vmem:[#allocation6 + $0x738] sm:$0xf0]  ;;  %v3734_v16 = vld [vmem:[#allocation9 + $0xe0] sm:$0xf] }
  0xee   :  { %1975 = vmatpush.bf16.msra.mxu3 %v2927_v45  ;;  %v3247_v45 = vor.u32 %v4029_v26, %v3244_v29  ;;  %v4045_v26 = vld [vmem:[#allocation6 + $0x54c] sm:$0xf]  ;;  %v3436_v29 = vld [vmem:[#allocation6 + $0x658] sm:$0xf0] }
  0xef   :  { %1988 = vmatpush.bf16.msra.mxu0 %v3055_v53  ;;  %v4089_v53 = vld [vmem:[#allocation6 + $0x6ac] sm:$0xf]  ;;  %v3292_v47 = vld [vmem:[#allocation6 + $0x538] sm:$0xf0] }
  0xf0   :  { %1950 = vmatpush.bf16.msra.mxu1 %v2655_v56  ;;  %v3615_v56 = vor.u32 %v4121_v39, %v3612_v40  ;;  %v3487_v0 = vor.u32 %v4089_v53, %v3484_v54  ;;  %v4009_v40 = vld [vmem:[#allocation6 + $0x42c] sm:$0xf]  ;;  %v3420_v49 = vld [vmem:[#allocation6 + $0x638] sm:$0xf0] }
  0xf1   :  { %1963 = vmatpush.bf16.msra.mxu2 %v2783_v61  ;;  %v3359_v61 = vor.u32 %v4057_v50, %v3356_v51  ;;  %v3551_v50 = vor.u32 %v4105_v33, %v3548_v34  ;;  %v4005_v51 = vld [vmem:[#allocation6 + $0x40c] sm:$0xf]  ;;  %v3532_v54 = vld [vmem:[#allocation6 + $0x718] sm:$0xf0]  ;;  %v3654_v33 = vld [vmem:[#allocation9 + $0x40] sm:$0xf] }
  0xf2   :  { %1976 = vmatpush.bf16.msra.mxu3 %v2911_v62  ;;  %v4021_v62 = vld [vmem:[#allocation6 + $0x48c] sm:$0xf]  ;;  %v3276_v4 = vld [vmem:[#allocation6 + $0x518] sm:$0xf0] }
  0xf3   :  { %1989 = vmatpush.bf16.msra.mxu0 %v3039_v9  ;;  %v3215_v6 = vor.u32 %v4021_v62, %v3212_v1  ;;  %v4017_v9 = vld [vmem:[#allocation6 + $0x46c] sm:$0xf]  ;;  %v4153_v17 = vld [vmem:[#allocation9 + $0xe4] sm:$0xf0] }
  0xf4   :  { %1951 = vmatpush.bf16.msra.mxu1 %v2639_v14  ;;  %v4081_v14 = vld [vmem:[#allocation6 + $0x66c] sm:$0xf]  ;;  %v4133_v34 = vld [vmem:[#allocation9 + $0x44] sm:$0xf0] }
  0xf5   :  { %1964 = vmatpush.bf16.msra.mxu2 %v2767_v21  ;;  %v3199_v21 = vor.u32 %v4017_v9, %v3196_v11  ;;  %v4101_v53 = vld [vmem:[#allocation6 + $0x70c] sm:$0xf]  ;;  %v3279_v11 = vor.u32 %v4037_v2, %v3276_v4 }
  0xf6   :  { %1977 = vmatpush.bf16.msra.mxu3 %v2895_v22  ;;  %v3327_v22 = vor.u32 %v4049_v12, %v3324_v13  ;;  %v4139_v62 = vld [vmem:[#allocation9 + $0x74] sm:$0xf0] }
  0xf7   :  { %1990 = vmatpush.bf16.msra.mxu0 %v3023_v28  ;;  %1952 = vmatmul.bf16.vlgmr.msra.gmra.mxu1 %v4402_v3  ;;  %v3580_v3 = vld [vmem:[#allocation6 + $0x778] sm:$0xf0]  ;;  %v4077_v28 = vld [vmem:[#allocation6 + $0x64c] sm:$0xf]  ;;  %v4467_v32 = vpop.f32.mrf.mxu0 }
  0xf8   :  { %1996 = vmatpush.bf16.msrb.mxu1 %v3263_v23  ;;  %1965 = vmatmul.bf16.vlgmr.msra.gmra.mxu2 %v4407_v19  ;;  %v4085_v19 = vld [vmem:[#allocation6 + $0x68c] sm:$0xf]  ;;  %v3455_v23 = vor.u32 %v4081_v14, %v3452_v15  ;;  %v4469_v35 = vpop.f32.mrf.mxu1  ;;  %v3439_v44 = vor.u32 %v4077_v28, %v3436_v29  ;;  %v3670_v14 = vld [vmem:[#allocation9 + $0x60] sm:$0xf]  ;;  %v4137_v15 = vld [vmem:[#allocation9 + $0x64] sm:$0xf0] }
  0xf9   :  { %2009 = vmatpush.bf16.msrb.mxu2 %v3391_v24  ;;  %1978 = vmatmul.bf16.vlgmr.msra.gmra.mxu3 %v4398_v52  ;;  %v3599_v52 = vor.u32 %v4117_v57, %v3596_v58  ;;  %v3471_v10 = vor.u32 %v4085_v19, %v3468_v20  ;;  %v3180_v24 = vld [vmem:[#allocation6 + $0x458] sm:$0xf0]  ;;  %v4069_v19 = vld [vmem:[#allocation6 + $0x60c] sm:$0xf]  ;;  %v3726_v28 = vld [vmem:[#allocation9 + $0xd0] sm:$0xf] }
  0xfa   :  { %2022 = vmatpush.bf16.msrb.mxu3 %v3519_v27  ;;  %1991 = vmatmul.bf16.vlgmr.msra.gmra.mxu0 %v4404_v7  ;;  %v3583_v7 = vor.u32 %v4113_v5, %v3580_v3  ;;  %v3308_v27 = vld [vmem:[#allocation6 + $0x558] sm:$0xf0]  ;;  %v3742_v5 = vld [vmem:[#allocation9 + $0xf0] sm:$0xf]  ;;  %v4155_v3 = vld [vmem:[#allocation9 + $0xf4] sm:$0xf0] }
  0xfb   :  { %2036 = vmatpush.bf16.msrb.mxu0 %v1630_v38  ;;  %v3183_v38 = vor.u32 %v4013_v60, %v3180_v24  ;;  %v3311_v39 = vor.u32 %v4045_v26, %v3308_v27  ;;  %v3404_v20 = vld [vmem:[#allocation6 + $0x618] sm:$0xf0]  ;;  %v3743_v13 = vor.u32 %v4155_v3, %v3742_v5  ;;  %v3662_v24 = vld [vmem:[#allocation9 + $0x50] sm:$0xf]  ;;  %v4135_v26 = vld [vmem:[#allocation9 + $0x54] sm:$0xf0] }
  0xfc   :  { %1997 = vmatpush.bf16.msrb.mxu1 %v3247_v45  ;;  %v3164_v45 = vld [vmem:[#allocation6 + $0x438] sm:$0xf0]  ;;  %v3407_v12 = vor.u32 %v4069_v19, %v3404_v20  ;;  %v4151_v29 = vld [vmem:[#allocation9 + $0xd4] sm:$0xf0]  ;;  %v3630_v19 = vld [vmem:[#allocation9 + $0x10] sm:$0xf] }
  0xfd   :  { %2010 = vmatpush.bf16.msrb.mxu2 %v3375_v46  ;;  %v4041_v46 = vld [vmem:[#allocation6 + $0x52c] sm:$0xf]  ;;  %v3167_v57 = vor.u32 %v4009_v40, %v3164_v45  ;;  %v4149_v40 = vld [vmem:[#allocation9 + $0xc4] sm:$0xf0] }
  0xfe   :  { %2023 = vmatpush.bf16.msrb.mxu3 %v3503_v48  ;;  %v4073_v48 = vld [vmem:[#allocation6 + $0x62c] sm:$0xf]  ;;  %v3295_v58 = vor.u32 %v4041_v46, %v3292_v47 }
  0xff   :  { %2037 = vmatpush.bf16.msrb.mxu0 %v3615_v56  ;;  %v1745_v56 = vpop.f32.mrf.mxu3  ;;  %v3423_v1 = vor.u32 %v4073_v48, %v3420_v49  ;;  %v4131_v45 = vld [vmem:[#allocation9 + $0x34] sm:$0xf0]  ;;  %v3806_v48 = vld [vmem:[#allocation9 + $0x170] sm:$0xf] }
 0x100   :  { %1998 = vmatpush.bf16.msrb.mxu1 %v3231_v59  ;;  %v3148_v59 = vld [vmem:[#allocation6 + $0x418] sm:$0xf0]  ;;  %v1773_v9 = vpop.f32.mrf.mxu1  ;;  %v4147_v47 = vld [vmem:[#allocation9 + $0xb4] sm:$0xf0] }
 0x101   :  { %2011 = vmatpush.bf16.msrb.mxu2 %v3359_v61  ;;  %v3678_v61 = vld [vmem:[#allocation9 + $0x70] sm:$0xf]  ;;  %v4171_v49 = vld [vmem:[#allocation9 + $0x174] sm:$0xf0] }
 0x102   :  { %2024 = vmatpush.bf16.msrb.mxu3 %v3487_v0  ;;  %v4471_v0 = vpop.f32.mrf.mxu2  ;;  %v4127_v20 = vld [vmem:[#allocation9 + $0x14] sm:$0xf0] }
 0x103   :  { %2038 = vmatpush.bf16.msrb.mxu0 %v3599_v52  ;;  %v3535_v52 = vor.u32 %v4101_v53, %v3532_v54  ;;  %v3638_v54 = vld [vmem:[#allocation9 + $0x20] sm:$0xf]  ;;  %v4143_v3 = vld [vmem:[#allocation9 + $0x94] sm:$0xf0] }
 0x104   :  { %1999 = vmatpush.bf16.msrb.mxu1 %v3215_v6  ;;  %v1760_v6 = vpop.f32.mrf.mxu0 }
 0x105   :  { %2012 = vmatpush.bf16.msrb.mxu2 %v3343_v8  ;;  %v3679_v8 = vor.u32 %v4139_v62, %v3678_v61  ;;  %v4167_v6 = vld [vmem:[#allocation9 + $0x154] sm:$0xf0] }
 0x106   :  { %2025 = vmatpush.bf16.msrb.mxu3 %v3471_v10  ;;  %v3151_v10 = vor.u32 %v4005_v51, %v3148_v59  ;;  %v3798_v59 = vld [vmem:[#allocation9 + $0x160] sm:$0xf] }
 0x107   :  { %2039 = vmatpush.bf16.msrb.mxu0 %v3583_v7  ;;  %v358_v7 = vperm.slane %v4443_v18, 1  ;;  %v3663_v18 = vor.u32 %v4135_v26, %v3662_v24  ;;  %v4154_v24 = vld [vmem:[#allocation9 + $0xf4] sm:$0xf]  ;;  %v3744_v26 = vld [vmem:[#allocation9 + $0xf8] sm:$0xf0] }
 0x108   :  { %2000 = vmatpush.bf16.msrb.mxu1 %v3199_v21  ;;  %v1747_v21 = vpop.f32.mrf.mxu3 }
 0x109   :  { %2013 = vmatpush.bf16.msrb.mxu2 %v3327_v22  ;;  %v3671_v22 = vor.u32 %v4137_v15, %v3670_v14  ;;  %v1746_v27 = vadd.f32 %v1745_v56, %v358_v7  ;;  %v4129_v56 = vld [vmem:[#allocation9 + $0x24] sm:$0xf0]  ;;  %v3686_v15 = vld [vmem:[#allocation9 + $0x80] sm:$0xf]  ;;  %v3680_v21 = vld [vmem:[#allocation9 + $0x78] sm:$0xf0] }
 0x10a   :  { %2026 = vmatpush.bf16.msrb.mxu3 %v3455_v23  ;;  %v1786_v60 = vpop.f32.mrf.mxu2  ;;  %v3735_v23 = vor.u32 %v4153_v17, %v3734_v16  ;;  %v4141_v7 = vld [vmem:[#allocation9 + $0x84] sm:$0xf0]  ;;  %v4138_v16 = vld [vmem:[#allocation9 + $0x74] sm:$0xf] }
 0x10b   :  { %2040 = vmatpush.bf16.msrb.mxu0 %v3567_v30  ;;  %v3727_v30 = vor.u32 %v4151_v29, %v3726_v28  ;;  %v3782_v60 = vld [vmem:[#allocation9 + $0x140] sm:$0xf] }
 0x10c   :  { %2001 = vmatpush.bf16.msrb.mxu1 %v3183_v38  ;;  %v1759_v38 = vadd.f32 %v4467_v32, %v1746_v27 }
 0x10d   :  { %2014 = vmatpush.bf16.msrb.mxu2 %v3311_v39  ;;  %v3718_v39 = vld [vmem:[#allocation9 + $0xc0] sm:$0xf] }
 0x10e   :  { %2027 = vmatpush.bf16.msrb.mxu3 %v3439_v44  ;;  %v1694_v44 = vadd.f32 %v4453_v31, %v4446_v25  ;;  %v1772_v46 = vadd.f32 %v4469_v35, %v1759_v38  ;;  %v3702_v25 = vld [vmem:[#allocation9 + $0xa0] sm:$0xf]  ;;  %v4169_v35 = vld [vmem:[#allocation9 + $0x164] sm:$0xf0]  ;;  %v3672_v38 = vld [vmem:[#allocation9 + $0x68] sm:$0xf0] }
 0x10f   :  { %2041 = vmatpush.bf16.msrb.mxu0 %v3551_v50  ;;  %v3807_v50 = vor.u32 %v4171_v49, %v3806_v48  ;;  %v3799_v62 = vor.u32 %v4169_v35, %v3798_v59 }
 0x110   :  { %2002 = vmatpush.bf16.msrb.mxu1 %v3167_v57  ;;  %v1707_v51 = vadd.f32 %v4455_v36, %v1694_v44  ;;  %v1785_v31 = vadd.f32 %v4471_v0, %v1772_v46  ;;  %v3790_v0 = vld [vmem:[#allocation9 + $0x150] sm:$0xf] }
 0x111   :  { %2015 = vmatpush.bf16.msrb.mxu2 %v3295_v58  ;;  %v4145_v58 = vld [vmem:[#allocation9 + $0xa4] sm:$0xf0]  ;;  %v3774_v44 = vld [vmem:[#allocation9 + $0x130] sm:$0xf] }
 0x112   :  { %2028 = vmatpush.bf16.msrb.mxu3 %v3423_v1  ;;  %v3639_v1 = vor.u32 %v4129_v56, %v3638_v54  ;;  %v1720_v2 = vadd.f32 %v4457_v55, %v1707_v51  ;;  %v3703_v4 = vor.u32 %v4145_v58, %v3702_v25  ;;  %v3664_v54 = vld [vmem:[#allocation9 + $0x58] sm:$0xf0]  ;;  %v4150_v56 = vld [vmem:[#allocation9 + $0xd4] sm:$0xf]  ;;  %v4159_v58 = vld [vmem:[#allocation9 + $0x114] sm:$0xf0] }
 0x113   :  { %2042 = vmatpush.bf16.msrb.mxu0 %v3535_v52  ;;  %v3694_v52 = vld [vmem:[#allocation9 + $0x90] sm:$0xf] }
 0x114   :  { %2003 = vmatpush.bf16.msrb.mxu1 %v3151_v10  ;;  %v3631_v10 = vor.u32 %v4127_v20, %v3630_v19  ;;  %v3695_v14 = vor.u32 %v4143_v3, %v3694_v52  ;;  %v4157_v19 = vld [vmem:[#allocation9 + $0x104] sm:$0xf0]  ;;  %v4170_v20 = vld [vmem:[#allocation9 + $0x174] sm:$0xf]  ;;  %v3808_v52 = vld [vmem:[#allocation9 + $0x178] sm:$0xf0] }
 0x115   :  { %2016 = vmatpush.bf16.msrb.mxu2 %v3279_v11  ;;  %v3622_v11 = vld [vmem:[#allocation9] sm:$0xf] }
 0x116   :  { %2029 = vmatpush.bf16.msrb.mxu3 %v3407_v12  ;;  %3619 = vmatmul.msk.bf16.vlgmr.msrb.gmra.mxu0 %vm1615_vm1, %v4415_v42  ;;  %v3655_v42 = vor.u32 %v4133_v34, %v3654_v33  ;;  %v4125_v12 = vld [vmem:[#allocation9 + $0x4] sm:$0xf0]  ;;  %v3683_v33 = vor.u32 %v4138_v16, %v3680_v21  ;;  %v4136_v34 = vld [vmem:[#allocation9 + $0x64] sm:$0xf] }
 0x117   :  { %2446 = vmatpush.bf16.msra.mxu0 %v3679_v8  ;;  %2004 = vmatmul.bf16.vlgmr.msrb.gmra.mxu1 %v4413_v41  ;;  %v3719_v41 = vor.u32 %v4149_v40, %v3718_v39  ;;  %v1810_v57 = vpop.f32.mrf.mxu0  ;;  %v3791_v8 = vor.u32 %v4167_v6, %v3790_v0  ;;  %v3675_v48 = vor.u32 %v4136_v34, %v3672_v38  ;;  %v4130_v0 = vld [vmem:[#allocation9 + $0x34] sm:$0xf]  ;;  %v3648_v6 = vld [vmem:[#allocation9 + $0x38] sm:$0xf0]  ;;  %v4168_v21 = vld [vmem:[#allocation9 + $0x164] sm:$0xf] }
 0x118   :  { %2459 = vmatpush.bf16.msra.mxu1 %v3743_v13  ;;  %2017 = vmatmul.bf16.vlgmr.msrb.gmra.mxu2 %v4417_v43  ;;  %v3646_v43 = vld [vmem:[#allocation9 + $0x30] sm:$0xf]  ;;  %v1823_v61 = vpop.f32.mrf.mxu1  ;;  %v1733_v13 = vadd.f32 %v4459_v63, %v1720_v2 }
 0x119   :  { %2030 = vmatmul.bf16.vlgmr.msrb.gmra.mxu3 %v4411_v37  ;;  %v3710_v37 = vld [vmem:[#allocation9 + $0xb0] sm:$0xf]  ;;  %v3647_v32 = vor.u32 %v4131_v45, %v3646_v43  ;;  %2472 = vmatpush.bf16.msra.mxu2 %v3807_v50  ;;  %v4152_v43 = vld [vmem:[#allocation9 + $0xe4] sm:$0xf]  ;;  %v3736_v45 = vld [vmem:[#allocation9 + $0xe8] sm:$0xf0] }
 0x11a   :  { %v3711_v53 = vor.u32 %v4147_v47, %v3710_v37  ;;  %v2048_v63 = vmax.f32 %v1733_v13, 0.0  ;;  %v3766_v50 = vld [vmem:[#allocation9 + $0x120] sm:$0xf]  ;;  %v3739_v51 = vor.u32 %v4152_v43, %v3736_v45 }
 0x11b   :  { %2447 = vmatpush.bf16.msra.mxu0 %v3671_v22  ;;  %v1836_v55 = vpop.f32.mrf.mxu2 }
 0x11c   :  { %2460 = vmatpush.bf16.msra.mxu1 %v3735_v23  ;;  %v1797_v36 = vpop.f32.mrf.mxu3  ;;  %v4165_v23 = vld [vmem:[#allocation9 + $0x144] sm:$0xf0]  ;;  %v4489_v47 = vpack.c.bf16 %v2048_v63, %v2048_v63  ;;  %v4166_v63 = vld [vmem:[#allocation9 + $0x154] sm:$0xf] }
 0x11d   :  { %2473 = vmatpush.bf16.msra.mxu2 %v3799_v62  ;;  %v1798_v5 = vadd.f32 %v1797_v36, %v1785_v31  ;;  %v3783_v28 = vor.u32 %v4165_v23, %v3782_v60  ;;  %v3728_v31 = vld [vmem:[#allocation9 + $0xd8] sm:$0xf0]  ;;  %v3656_v62 = vld [vmem:[#allocation9 + $0x48] sm:$0xf0] }
 0x11e   :  { %v3731_v35 = vor.u32 %v4150_v56, %v3728_v31  ;;  %v3720_v36 = vld [vmem:[#allocation9 + $0xc8] sm:$0xf0] }
 0x11f   :  { %2448 = vmatpush.bf16.msra.mxu0 %v3663_v18  ;;  %v1811_v9 = vadd.f32 %v1810_v57, %v1798_v5  ;;  %v1812_v22 = vpop.f32.mrf.mxu0  ;;  %v3623_v18 = vor.u32 %v4125_v12, %v3622_v11  ;;  %v3758_v57 = vld [vmem:[#allocation9 + $0x110] sm:$0xf]  ;;  %v3811_v11 = vor.u32 %v4170_v20, %v3808_v52  ;;  %v3651_v12 = vor.u32 %v4130_v0, %v3648_v6  ;;  %v3768_v31 = vld [vmem:[#allocation9 + $0x128] sm:$0xf0] }
 0x120   :  { %2461 = vmatpush.bf16.msra.mxu1 %v3727_v30  ;;  %v1825_v27 = vpop.f32.mrf.mxu1  ;;  %v3687_v30 = vor.u32 %v4141_v7, %v3686_v15  ;;  %v3759_v2 = vor.u32 %v4159_v58, %v3758_v57  ;;  %v4144_v15 = vld [vmem:[#allocation9 + $0xa4] sm:$0xf]  ;;  %v3704_v7 = vld [vmem:[#allocation9 + $0xa8] sm:$0xf0]  ;;  %v3870_v58 = vld [vmem:[#allocation9 + $0x1f0] sm:$0xf] }
 0x121   :  { %2474 = vmatpush.bf16.msra.mxu2 %v3791_v8  ;;  %v1824_v17 = vadd.f32 %v1823_v61, %v1811_v9  ;;  %v4132_v61 = vld [vmem:[#allocation9 + $0x44] sm:$0xf]  ;;  %v4146_v9 = vld [vmem:[#allocation9 + $0xb4] sm:$0xf]  ;;  %v3800_v22 = vld [vmem:[#allocation9 + $0x168] sm:$0xf0] }
 0x122   :  { %v3659_v5 = vor.u32 %v4132_v61, %v3656_v62  ;;  %v3803_v23 = vor.u32 %v4168_v21, %v3800_v22  ;;  %v3632_v27 = vld [vmem:[#allocation9 + $0x18] sm:$0xf0]  ;;  %v3752_v0 = vld [vmem:[#allocation9 + $0x108] sm:$0xf0] }
 0x123   :  { %2449 = vmatpush.bf16.msra.mxu0 %v3655_v42  ;;  %v1837_v29 = vadd.f32 %v1836_v55, %v1824_v17  ;;  %v3747_v42 = vor.u32 %v4154_v24, %v3744_v26  ;;  %v1838_v49 = vpop.f32.mrf.mxu2  ;;  %v4128_v55 = vld [vmem:[#allocation9 + $0x24] sm:$0xf]  ;;  %v3707_v24 = vor.u32 %v4144_v15, %v3704_v7  ;;  %v4126_v26 = vld [vmem:[#allocation9 + $0x14] sm:$0xf]  ;;  %v3846_v15 = vld [vmem:[#allocation9 + $0x1c0] sm:$0xf] }
 0x124   :  { %2462 = vmatpush.bf16.msra.mxu1 %v3719_v41  ;;  %v1799_v39 = vpop.f32.mrf.mxu3  ;;  %v4163_v41 = vld [vmem:[#allocation9 + $0x134] sm:$0xf0]  ;;  %v4181_v7 = vld [vmem:[#allocation9 + $0x1c4] sm:$0xf0] }
 0x125   :  { %2475 = vmatpush.bf16.msra.mxu2 %v3783_v28  ;;  %v2049_v40 = vmax.f32 %v1837_v29, 0.0  ;;  %v3775_v37 = vor.u32 %v4163_v41, %v3774_v44  ;;  %v4142_v29 = vld [vmem:[#allocation9 + $0x94] sm:$0xf]  ;;  %v4124_v39 = vld [vmem:[#allocation9 + $0x4] sm:$0xf]  ;;  %v3847_v22 = vor.u32 %v4181_v7, %v3846_v15 }
 0x126   :  { %v4140_v44 = vld [vmem:[#allocation9 + $0x84] sm:$0xf]  ;;  %v3688_v41 = vld [vmem:[#allocation9 + $0x88] sm:$0xf0] }
 0x127   :  { %2450 = vmatpush.bf16.msra.mxu0 %v3647_v32  ;;  %v4487_v46 = vpack.c.bf16 %v2049_v40, %v2049_v40  ;;  %v4161_v32 = vld [vmem:[#allocation9 + $0x124] sm:$0xf0]  ;;  %v3624_v40 = vld [vmem:[#allocation9 + $0x8] sm:$0xf0] }
 0x128   :  { %2463 = vmatpush.bf16.msra.mxu1 %v3711_v53  ;;  %v4134_v53 = vld [vmem:[#allocation9 + $0x54] sm:$0xf]  ;;  %v3767_v25 = vor.u32 %v4161_v32, %v3766_v50  ;;  %v3627_v49 = vor.u32 %v4124_v39, %v3624_v40  ;;  %v3691_v32 = vor.u32 %v4140_v44, %v3688_v41  ;;  %v4175_v39 = vld [vmem:[#allocation9 + $0x194] sm:$0xf0]  ;;  %v3814_v44 = vld [vmem:[#allocation9 + $0x180] sm:$0xf] }
 0x129   :  { %2476 = vmatpush.bf16.msra.mxu2 %v3775_v37  ;;  %v3667_v59 = vor.u32 %v4134_v53, %v3664_v54  ;;  %v4164_v37 = vld [vmem:[#allocation9 + $0x144] sm:$0xf]  ;;  %v4162_v53 = vld [vmem:[#allocation9 + $0x134] sm:$0xf]  ;;  %v3776_v54 = vld [vmem:[#allocation9 + $0x138] sm:$0xf0] }
 0x12a   :  { %v3779_v56 = vor.u32 %v4162_v53, %v3776_v54  ;;  %v4173_v41 = vld [vmem:[#allocation9 + $0x184] sm:$0xf0]  ;;  %v4182_v54 = vld [vmem:[#allocation9 + $0x1d4] sm:$0xf] }
 0x12b   :  { %2451 = vmatpush.bf16.msra.mxu0 %v3639_v1  ;;  %v4148_v1 = vld [vmem:[#allocation9 + $0xc4] sm:$0xf] }
 0x12c   :  { %2464 = vmatpush.bf16.msra.mxu1 %v3703_v4  ;;  %v3750_v4 = vld [vmem:[#allocation9 + $0x100] sm:$0xf]  ;;  %v3723_v3 = vor.u32 %v4148_v1, %v3720_v36  ;;  %v4158_v36 = vld [vmem:[#allocation9 + $0x114] sm:$0xf] }
 0x12d   :  { %2477 = vmatpush.bf16.msra.mxu2 %v3767_v25  ;;  %v3751_v8 = vor.u32 %v4157_v19, %v3750_v4  ;;  %v4160_v25 = vld [vmem:[#allocation9 + $0x124] sm:$0xf]  ;;  %v3760_v4 = vld [vmem:[#allocation9 + $0x118] sm:$0xf0]  ;;  %v4185_v19 = vld [vmem:[#allocation9 + $0x1e4] sm:$0xf0] }
 0x12e   :  { %v3771_v62 = vor.u32 %v4160_v25, %v3768_v31 }
 0x12f   :  { %2452 = vmatpush.bf16.msra.mxu0 %v3631_v10  ;;  %v3712_v10 = vld [vmem:[#allocation9 + $0xb8] sm:$0xf0] }
 0x130   :  { %2465 = vmatpush.bf16.msra.mxu1 %v3695_v14  ;;  %v3715_v13 = vor.u32 %v4146_v9, %v3712_v10  ;;  %v3640_v14 = vld [vmem:[#allocation9 + $0x28] sm:$0xf0] }
 0x131   :  { %2478 = vmatpush.bf16.msra.mxu2 %v3759_v2  ;;  %v3643_v60 = vor.u32 %v4128_v55, %v3640_v14  ;;  %v3862_v2 = vld [vmem:[#allocation9 + $0x1e0] sm:$0xf] }
 0x132   :  { %v3863_v20 = vor.u32 %v4185_v19, %v3862_v2  ;;  %v4178_v2 = vld [vmem:[#allocation9 + $0x1b4] sm:$0xf] }
 0x133   :  { %2453 = vmatpush.bf16.msra.mxu0 %v3623_v18  ;;  %v3696_v18 = vld [vmem:[#allocation9 + $0x98] sm:$0xf0] }
 0x134   :  { %2466 = vmatpush.bf16.msra.mxu1 %v3687_v30  ;;  %v3792_v30 = vld [vmem:[#allocation9 + $0x158] sm:$0xf0]  ;;  %v3699_v38 = vor.u32 %v4142_v29, %v3696_v18  ;;  %v3830_v29 = vld [vmem:[#allocation9 + $0x1a0] sm:$0xf]  ;;  %v4177_v18 = vld [vmem:[#allocation9 + $0x1a4] sm:$0xf0] }
 0x135   :  { %2479 = vmatpush.bf16.msra.mxu2 %v3751_v8  ;;  %v3795_v34 = vor.u32 %v4166_v63, %v3792_v30 }
 0x136   :  { %2454 = vmatmul.bf16.vlgmr.msra.gmra.mxu0 %v4489_v47 }
 0x137   :  { %2498 = vmatpush.bf16.msrb.mxu0 %v3683_v33  ;;  %2467 = vmatmul.bf16.vlgmr.msra.gmra.mxu1 %v4487_v46  ;;  %v4493_v16 = vpop.f32.mrf.mxu0  ;;  %v3635_v33 = vor.u32 %v4126_v26, %v3632_v27 }
 0x138   :  { %2511 = vmatpush.bf16.msrb.mxu1 %v3747_v42  ;;  %v4495_v17 = vpop.f32.mrf.mxu1 }
 0x139   :  { %2524 = vmatpush.bf16.msrb.mxu2 %v3811_v11  ;;  %v3854_v11 = vld [vmem:[#allocation9 + $0x1d0] sm:$0xf] }
 0x13b   :  { %2499 = vmatpush.bf16.msrb.mxu0 %v3675_v48  ;;  %v1849_v42 = vpop.f32.mrf.mxu2  ;;  %v3784_v48 = vld [vmem:[#allocation9 + $0x148] sm:$0xf0] }
 0x13c   :  { %2512 = vmatpush.bf16.msrb.mxu1 %v3739_v51  ;;  %v1862_v28 = vpop.f32.mrf.mxu3  ;;  %v3787_v50 = vor.u32 %v4164_v37, %v3784_v48  ;;  %v3872_v37 = vld [vmem:[#allocation9 + $0x1f8] sm:$0xf0] }
 0x13d   :  { %2525 = vmatpush.bf16.msrb.mxu2 %v3803_v23  ;;  %v4179_v23 = vld [vmem:[#allocation9 + $0x1b4] sm:$0xf0] }
 0x13f   :  { %2500 = vmatpush.bf16.msrb.mxu0 %v3667_v59  ;;  %v1877_v43 = vpop.f32.mrf.mxu0  ;;  %v4187_v59 = vld [vmem:[#allocation9 + $0x1f4] sm:$0xf0] }
 0x140   :  { %2513 = vmatpush.bf16.msrb.mxu1 %v3731_v35  ;;  %v1890_v45 = vpop.f32.mrf.mxu1  ;;  %v4497_v35 = vld [vmem:[#allocation8] sm:$0xf]  ;;  %v3871_v1 = vor.u32 %v4187_v59, %v3870_v58  ;;  %v3815_v43 = vor.u32 %v4173_v41, %v3814_v44  ;;  %v4180_v59 = vld [vmem:[#allocation9 + $0x1c4] sm:$0xf] }
 0x141   :  { %2526 = vmatpush.bf16.msrb.mxu2 %v3795_v34  ;;  %v359_v61 = vperm.slane %v4497_v35, 2  ;;  %v4186_v45 = vld [vmem:[#allocation9 + $0x1f4] sm:$0xf] }
 0x142   :  { %2485 = vmatpush.bf16.msra.mxu3 %v3871_v1  ;;  %v3875_v48 = vor.u32 %v4186_v45, %v3872_v37 }
 0x143   :  { %2501 = vmatpush.bf16.msrb.mxu0 %v3659_v5  ;;  %v1851_v57 = vpop.f32.mrf.mxu2  ;;  %v1850_v52 = vadd.f32 %v1849_v42, %v359_v61  ;;  %v3763_v5 = vor.u32 %v4158_v36, %v3760_v4  ;;  %v3848_v61 = vld [vmem:[#allocation9 + $0x1c8] sm:$0xf0]  ;;  %v3840_v36 = vld [vmem:[#allocation9 + $0x1b8] sm:$0xf0] }
 0x144   :  { %2514 = vmatpush.bf16.msrb.mxu1 %v3723_v3  ;;  %v1864_v51 = vpop.f32.mrf.mxu3  ;;  %v4156_v3 = vld [vmem:[#allocation9 + $0x104] sm:$0xf]  ;;  %v3843_v19 = vor.u32 %v4178_v2, %v3840_v36 }
 0x145   :  { %2527 = vmatpush.bf16.msrb.mxu2 %v3787_v50  ;;  %v1863_v6 = vadd.f32 %v1862_v28, %v1850_v52  ;;  %v3755_v8 = vor.u32 %v4156_v3, %v3752_v0  ;;  %v4184_v50 = vld [vmem:[#allocation9 + $0x1e4] sm:$0xf]  ;;  %v3832_v52 = vld [vmem:[#allocation9 + $0x1a8] sm:$0xf0]  ;;  %v360_v3 = vperm.slane %v4497_v35, 3 }
 0x146   :  { %2486 = vmatpush.bf16.msra.mxu3 %v3863_v20  ;;  %v4176_v20 = vld [vmem:[#allocation9 + $0x1a4] sm:$0xf] }
 0x147   :  { %2502 = vmatpush.bf16.msrb.mxu0 %v3651_v12  ;;  %v1876_v9 = vadd.f32 %v4493_v16, %v1863_v6  ;;  %v4183_v12 = vld [vmem:[#allocation9 + $0x1d4] sm:$0xf0]  ;;  %v3835_v0 = vor.u32 %v4176_v20, %v3832_v52  ;;  %v4174_v6 = vld [vmem:[#allocation9 + $0x194] sm:$0xf]  ;;  %v2595_v20 = vld [vmem:[#allocation2] sm:$0x1] }
 0x148   :  { %2515 = vmatpush.bf16.msrb.mxu1 %v3715_v13  ;;  %v3855_v13 = vor.u32 %v4183_v12, %v3854_v11  ;;  %v4172_v11 = vld [vmem:[#allocation9 + $0x184] sm:$0xf]  ;;  %v3816_v12 = vld [vmem:[#allocation9 + $0x188] sm:$0xf0]  ;;  %v4338_v52 = vmov 0  }
 0x149   :  { %2528 = vmatpush.bf16.msrb.mxu2 %v3779_v56  ;;  %v3856_v56 = vld [vmem:[#allocation9 + $0x1d8] sm:$0xf0]  ;;  %4199 = vset.pattern.permute.xlu1 %v4338_v52 }
 0x14a   :  { %2487 = vmatpush.bf16.msra.mxu3 %v3855_v13  ;;  %v3859_v31 = vor.u32 %v4182_v54, %v3856_v56  ;;  %v3819_v13 = vor.u32 %v4172_v11, %v3816_v12  ;;  %2598 = vperm.xlu1 %4199, %v2595_v20  }
 0x14b   :  { %2503 = vmatpush.bf16.msrb.mxu0 %v3643_v60  ;;  %v3838_v60 = vld [vmem:[#allocation9 + $0x1b0] sm:$0xf] }
 0x14c   :  { %2516 = vmatpush.bf16.msrb.mxu1 %v3707_v24  ;;  %v3839_v16 = vor.u32 %v4179_v23, %v3838_v60 }
 0x14d   :  { %2529 = vmatpush.bf16.msrb.mxu2 %v3771_v62  ;;  %v3851_v62 = vor.u32 %v4180_v59, %v3848_v61 }
 0x14e   :  { %2488 = vmatpush.bf16.msra.mxu3 %v3847_v22 }
 0x14f   :  { %2504 = vmatpush.bf16.msrb.mxu0 %v3635_v33  ;;  %v3831_v33 = vor.u32 %v4177_v18, %v3830_v29  ;;  %v2120_v18 = vld [vmem:[%s4518_s4] sm:$0x3] }
 0x150   :  { %2517 = vmatpush.bf16.msrb.mxu1 %v3699_v38  ;;  %v3822_v38 = vld [vmem:[#allocation9 + $0x190] sm:$0xf] }
 0x151   :  { %2530 = vmatpush.bf16.msrb.mxu2 %v3763_v5  ;;  %v3823_v42 = vor.u32 %v4175_v39, %v3822_v38 }
 0x152   :  { %2489 = vmatpush.bf16.msra.mxu3 %v3839_v16 }
 0x153   :  { %2505 = vmatpush.bf16.msrb.mxu0 %v3627_v49 }
 0x154   :  { %2518 = vmatpush.bf16.msrb.mxu1 %v3691_v32  ;;  %v1940_v10 = vpop.f32.mrf.mxu1  ;;  %v3864_v32 = vld [vmem:[#allocation9 + $0x1e8] sm:$0xf0] }
 0x155   :  { %2531 = vmatpush.bf16.msrb.mxu2 %v3755_v8  ;;  %v3867_v51 = vor.u32 %v4184_v50, %v3864_v32  ;;  %v3824_v8 = vld [vmem:[#allocation9 + $0x198] sm:$0xf0] }
 0x156   :  { %2506 = vmatmul.bf16.vlgmr.msrb.gmra.mxu0 %v4489_v47  ;;  %2490 = vmatpush.bf16.msra.mxu3 %v3831_v33 }
 0x157   :  { %2519 = vmatmul.bf16.vlgmr.msrb.gmra.mxu1 %v4487_v46  ;;  %v1927_v47 = vpop.f32.mrf.mxu0  ;;  %v1889_v46 = vadd.f32 %v4495_v17, %v1876_v9 }
 0x15a   :  { %2491 = vmatpush.bf16.msra.mxu3 %v3823_v42 }
 0x15b   :  { %v1901_v14 = vpop.f32.mrf.mxu2 }
 0x15c   :  { %v1914_v55 = vpop.f32.mrf.mxu3  ;;  %v1902_v21 = vadd.f32 %v1901_v14, %v1889_v46  ;;  %v1942_v27 = vpop.f32.mrf.mxu1 }
 0x15e   :  { %v1915_v24 = vadd.f32 %v1914_v55, %v1902_v21  ;;  %2492 = vmatpush.bf16.msra.mxu3 %v3815_v43 }
 0x15f   :  { %v1929_v28 = vpop.f32.mrf.mxu0 }
 0x160   :  { %v1928_v26 = vadd.f32 %v1927_v47, %v1915_v24  ;;  %v3827_v47 = vor.u32 %v4174_v6, %v3824_v8 }
 0x162   :  { %v1941_v63 = vadd.f32 %v1940_v10, %v1928_v26  ;;  %2537 = vmatpush.bf16.msrb.mxu3 %v3875_v48 }
 0x163   :  { %v1903_v17 = vpop.f32.mrf.mxu2 }
 0x164   :  { %v1916_v30 = vpop.f32.mrf.mxu3  ;;  %v2050_v34 = vmax.f32 %v1941_v63, 0.0  ;;  %v2122_v63 = vperm.slane %v2120_v18, 0 }
 0x166   :  { %v2054_v40 = vpack.c.bf16 %v2050_v34, %v2050_v34  ;;  %2538 = vmatpush.bf16.msrb.mxu3 %v3867_v51 }
 0x168   :  { %2480 = vmatmul.bf16.vlgmr.msra.gmra.mxu2 %v2054_v40 }
 0x16a   :  { %2539 = vmatpush.bf16.msrb.mxu3 %v3859_v31 }
 0x16e   :  { %2540 = vmatpush.bf16.msrb.mxu3 %v3851_v62 }
 0x172   :  { %2541 = vmatpush.bf16.msrb.mxu3 %v3843_v19 }
 0x174   :  { %v1953_v49 = vpop.f32.mrf.mxu1 }
 0x175   :  { %v1954_v9 = vadd.f32 %v1953_v49, %v360_v3 }
 0x176   :  { %2542 = vmatpush.bf16.msrb.mxu3 %v3835_v0 }
 0x177   :  { %v1992_v53 = vpop.f32.mrf.mxu0 }
 0x178   :  { %2532 = vmatmul.bf16.vlgmr.msrb.gmra.mxu2 %v2054_v40  ;;  %v2123_v40 = vperm.slane %v2120_v18, 1 }
 0x17a   :  { %2543 = vmatpush.bf16.msrb.mxu3 %v3827_v47 }
 0x17b   :  { %v1966_v25 = vpop.f32.mrf.mxu2 }
 0x17c   :  { %v1979_v57 = vpop.f32.mrf.mxu3  ;;  %v1955_v58 = vpop.f32.mrf.mxu1  ;;  %v1967_v10 = vadd.f32 %v1966_v25, %v1954_v9  ;;  %v2552_v25 = vld [vmem:[%s4519_s5] sm:$0x3]  ;;  %s4339_s5 = smov [#allocation11]  }
 0x17d   :  { %v2554_v61 = vperm.slane %v2552_v25, 0  ;;  %v2555_v62 = vperm.slane %v2552_v25, 1  ;;  %s2610_s25 = sshll.u32 %s4339_s5, 4  ;;  %s2611_s25 = int_to_ptr.vmem [resolvable:$true] %s2610_s25 }
 0x17e   :  { %v1980_v46 = vadd.f32 %v1979_v57, %v1967_v10  ;;  %2544 = vmatpush.bf16.msrb.mxu3 %v3819_v13 }
 0x17f   :  { %v1994_v1 = vpop.f32.mrf.mxu0 }
 0x180   :  { %v1993_v15 = vadd.f32 %v1992_v53, %v1980_v46 }
 0x183   :  { %v1968_v4 = vpop.f32.mrf.mxu2 }
 0x184   :  { %v1981_v5 = vpop.f32.mrf.mxu3 }
 0x193   :  { %v2044_v55 = vpop.f32.mrf.mxu0 }
 0x194   :  { %v2005_v14 = vpop.f32.mrf.mxu1 }
 0x195   :  { %v2006_v7 = vadd.f32 %v2005_v14, %v1993_v15 }
 0x19b   :  { %v2018_v21 = vpop.f32.mrf.mxu2  ;;  %v2046_v60 = vpop.f32.mrf.mxu0 }
 0x19c   :  { %v2019_v35 = vadd.f32 %v2018_v21, %v2006_v7  ;;  %v2031_v22 = vpop.f32.mrf.mxu3  ;;  %v2007_v23 = vpop.f32.mrf.mxu1 }
 0x19e   :  { %v2032_v24 = vadd.f32 %v2031_v22, %v2019_v35 }
 0x1a0   :  { %v2045_v16 = vadd.f32 %v2044_v55, %v2032_v24 }
 0x1a2   :  { %v2051_v26 = vmax.f32 %v2045_v16, 0.0 }
 0x1a3   :  { %v2020_v27 = vpop.f32.mrf.mxu2 }
 0x1a4   :  { %v2055_v28 = vpack.c.bf16 %v2051_v26, %v2051_v26  ;;  %v2033_v29 = vpop.f32.mrf.mxu3 }
 0x1a6   :  { %2493 = vmatmul.bf16.vlgmr.msra.gmra.mxu3 %v2055_v28 }
 0x1b3   :  { %v2455_v30 = vpop.f32.mrf.mxu0 }
 0x1b4   :  { %v2456_v17 = vadd.f32 %v2455_v30, %v2122_v63  ;;  %v2468_v33 = vpop.f32.mrf.mxu1 }
 0x1b6   :  { %v2469_v34 = vadd.f32 %v2468_v33, %v2456_v17  ;;  %2545 = vmatmul.bf16.vlgmr.msrb.gmra.mxu3 %v2055_v28 }
 0x1bb   :  { %v2457_v38 = vpop.f32.mrf.mxu0 }
 0x1bc   :  { %v2470_v39 = vpop.f32.mrf.mxu1  ;;  %v2599_v3 = vpop.permute.xlu1 %2598 }
 0x1bd   :  { %v2601_v0 = vperm.slane %v2599_v3, 0 }
 0x1d3   :  { %v2507_v42 = vpop.f32.mrf.mxu0 }
 0x1d4   :  { %v2508_v44 = vadd.f32 %v2507_v42, %v2123_v40  ;;  %v2520_v41 = vpop.f32.mrf.mxu1 }
 0x1d6   :  { %v2521_v43 = vadd.f32 %v2520_v41, %v2508_v44 }
 0x1db   :  { %v2509_v45 = vpop.f32.mrf.mxu0 }
 0x1dc   :  { %v2522_v37 = vpop.f32.mrf.mxu1 }
 0x1eb   :  { %v2481_v48 = vpop.f32.mrf.mxu2 }
 0x1ec   :  { %v2482_v49 = vadd.f32 %v2481_v48, %v2469_v34 }
 0x1f3   :  { %v2483_v50 = vpop.f32.mrf.mxu2 }
 0x1fb   :  { %v2533_v32 = vpop.f32.mrf.mxu2 }
 0x1fc   :  { %v2534_v31 = vadd.f32 %v2533_v32, %v2521_v43 }
 0x203   :  { %v2535_v51 = vpop.f32.mrf.mxu2 }
 0x229   :  { %v2494_v53 = vpop.f32.mrf.mxu3 }
 0x22a   :  { %v2495_v56 = vadd.f32 %v2494_v53, %v2482_v49 }
 0x22c   :  { %v2550_v58 = vmax.f32 %v2495_v56, 0.0 }
 0x22e   :  { %v2558_v2 = vmul.f32 %v2554_v61, %v2550_v58 }
 0x231   :  { %v2496_v54 = vpop.f32.mrf.mxu3 }
 0x239   :  { %v2546_v57 = vpop.f32.mrf.mxu3 }
 0x23a   :  { %v2547_v59 = vadd.f32 %v2546_v57, %v2534_v31 }
 0x23c   :  { %v2551_v1 = vmax.f32 %v2547_v59, 0.0 }
 0x23e   :  { %v2559_v36 = vmul.f32 %v2555_v62, %v2551_v1 }
 0x240   :  { %v2560_v4 = vadd.f32 %v2559_v36, %v2558_v2 }
 0x241   :  { %v2548_v19 = vpop.f32.mrf.mxu3 }
 0x242   :  { %2561 = vadd.xlane.f32.xlu0 %v2560_v4 }
 0x2b5   :  { %v2562_v5 = vpop.xlane.xlu0 %2561 }
 0x2b6   :  { %2563 = vxpose.xlu0.b32.start.end [1/1] (short) (narrow) %v2562_v5, 8 }
 0x31d   :  { %4200 = vset.pattern.permute.xlu0 %v4338_v52 }
 0x35a   :  { %v2579_v6 = vpop.trf.xlu0 }
 0x35b   :  { %v2602_v8 = vadd.f32 %v2601_v0, %v2579_v6 }
 0x35d   :  { %2604 = vst.msk [vmem:[#allocation11] sm:$0x1] %vm2603_vm2, %v2602_v8 }
 0x35e   :  { %2615 = dma.vmem_to_hbm [thread:$0]  %s2611_s25, 16, %s2613_s28, [#allocation5]  }
 0x35f   :  { %4328 = dma.done.wait [#allocation5], 16  }
 0x360   :  { %4329 = vsyncadd [#allocation5], 4294967280 }
 0x361   :  { %2620 = vsyncpa [#allocation4], 1 }
 0x362   :  { %2621 = vsyncpa [#allocation7], 1 }
 0x363   :  { %2622 = vsyncpa [#allocation10], 1 }
 0x364   :  { %2623 = vsyncpa [#allocation5], 1 }

</bundles_post_ra>
